<compile_context>
chip_gen: v6e
topology: v6e:2x2x1
jax: 0.10.0
libtpu: 0.0.40
codegen_flags: <defaults>
</compile_context>

<pallas_src>
import math

import jax
import jax.numpy as jnp
from jax.experimental import pallas as pl
from jax.experimental.pallas import tpu as pltpu

LANE = 128
SUBLANE = 8


def _round_up(n, m):
    return ((n + m - 1) // m) * m


def _tpu_generation():
    try:
        kind = jax.devices()[0].device_kind.lower()
    except Exception:
        return None
    if "v5 lite" in kind or "v5e" in kind or "v5lite" in kind:
        return "v5e"
    if "v6" in kind:
        return "v6e"
    if "v7" in kind or "7x" in kind:
        return "v7x"
    return None


def _gelu_exact(x):
    # PyTorch nn.GELU() (approximate='none'): 0.5*x*(1+erf(x/sqrt(2)))
    return 0.5 * x * (1.0 + jax.lax.erf(x * (1.0 / math.sqrt(2.0))))


def _sigmoid_via_tanh(z):
    # Exact identity; tanh is a single EUP issue (EUP slot is otherwise idle here).
    return 0.5 * (jnp.tanh(0.5 * z) + 1.0)


def _padded_layernorm(h, gamma, beta, true_w, eps=1e-5):
    """LayerNorm over the first `true_w` lanes of a zero-padded feature axis.

    Requires h[:, true_w:] == 0 and zero-padded gamma/beta (padded output lanes
    then come out exactly zero).  Variance via E[h^2] - mu^2: both sums are
    exact because padded lanes are exact zeros, so no lane mask is needed.
    """
    inv_w = 1.0 / float(true_w)
    mu = jnp.sum(h, axis=-1, keepdims=True) * inv_w
    ex2 = jnp.sum(h * h, axis=-1, keepdims=True) * inv_w
    var = jnp.maximum(ex2 - mu * mu, 0.0)
    return (h - mu) * jax.lax.rsqrt(var + eps) * gamma + beta


def _layernorm(h, gamma, beta, eps=1e-5):
    mu = jnp.mean(h, axis=-1, keepdims=True)
    var = jnp.mean((h - mu) ** 2, axis=-1, keepdims=True)
    return (h - mu) * jax.lax.rsqrt(var + eps) * gamma + beta


def _make_kernel(*, hidden, input_dim, output_dim, hp, dp, op, fuse_stage2):
    def kernel(x_ref, wcat_ref, bcat_ref, ln1g_ref, ln1b_ref,
               lncg_ref, lncb_ref, *rest):
        if fuse_stage2:
            w2bd_ref, b2cat_ref, ong_ref, onb_ref, out_ref = rest
        else:
            w2_ref, wc2_ref, b2cat_ref, ong_ref, onb_ref, out_ref = rest

        # bf16 cast in-kernel (no wrapper-side pad/cast HBM round trip).
        x = x_ref[...].astype(jnp.bfloat16)

        # ---- fused first-stage matmul: x @ [w1 | wc1 | wf] (one MXU call) ----
        z = jnp.dot(x, wcat_ref[...],
                    preferred_element_type=jnp.float32) + bcat_ref[...]
        h_pre = z[:, :hp]               # transform branch pre-activation
        c_pre = z[:, hp:hp + dp]        # context-gate branch pre-activation
        f_pre = z[:, hp + dp:]          # feature-gate pre-activation

        # transform branch: LayerNorm -> GELU -> (Dropout(0.1) == identity)
        h = _gelu_exact(_padded_layernorm(h_pre, ln1g_ref[...], ln1b_ref[...], hidden))
        # context-gate branch: LayerNorm -> GELU
        c = _gelu_exact(_padded_layernorm(c_pre, lncg_ref[...], lncb_ref[...], input_dim))

        h16 = h.astype(jnp.bfloat16)
        c16 = c.astype(jnp.bfloat16)
        b2cat = b2cat_ref[...]

        if fuse_stage2:
            # ---- fused second stage: [h | c] @ blockdiag(w2, wc2) (v6e/v7x) ----
            hc = jnp.concatenate([h16, c16], axis=-1)
            z2 = jnp.dot(hc, w2bd_ref[...],
                         preferred_element_type=jnp.float32) + b2cat
            transformed = z2[:, :op]
            cg_pre = z2[:, op:]
        else:
            # ---- un-fused second stage: two 128-K dots (v5e, 4x128^2 MXU) ----
            transformed = jnp.dot(h16, w2_ref[...],
                                  preferred_element_type=jnp.float32) + b2cat[:, :op]
            cg_pre = jnp.dot(c16, wc2_ref[...],
                             preferred_element_type=jnp.float32) + b2cat[:, op:]

        context_gates = _sigmoid_via_tanh(cg_pre)
        feature_gates = _sigmoid_via_tanh(f_pre)
        combined_gate = 0.7 * context_gates + 0.3 * feature_gates
        gated = transformed * combined_gate
        y = _padded_layernorm(gated, ong_ref[...], onb_ref[...], output_dim)
        out_ref[...] = y.astype(out_ref.dtype)

    return kernel


def style_transformer_forward(x, params, *, tm=None, out_dtype=jnp.float32,
                              fuse_stage2=None, interpret=False):
    B, Din = x.shape
    hidden = params["w1"].shape[1]
    Dout = params["w2"].shape[1]

    Hp = _round_up(hidden, LANE)
    Dp = _round_up(Din, LANE)
    Op = _round_up(Dout, LANE)

    gen = _tpu_generation()
    if fuse_stage2 is None:
        fuse_stage2 = gen != "v5e"      # blockdiag fusion pays on 256-wide MXU only

    def pad2(a, rows, cols):
        r, c = a.shape
        return jnp.pad(a, ((0, rows - r), (0, cols - c)))

    # ---- wrapper-side weight fusion / lane padding / bf16 cast (zero padding!) ----
    # Note: K axis (rows) of the first-stage weights stays at the true Din.
    wcat = jnp.concatenate(
        [pad2(params["w1"], Din, Hp),
         pad2(params["wc1"], Din, Dp),
         pad2(params["wf"], Din, Op)], axis=1).astype(jnp.bfloat16)
    bcat = jnp.concatenate(
        [pad2(params["b1"], 1, Hp),
         pad2(params["bc1"], 1, Dp),
         pad2(params["bf"], 1, Op)], axis=1).astype(jnp.float32)

    b2cat = jnp.concatenate(
        [pad2(params["b2"], 1, Op), pad2(params["bc2"], 1, Op)], axis=1
    ).astype(jnp.float32)

    ln1_g = pad2(params["ln1_g"], 1, Hp)
    ln1_b = pad2(params["ln1_b"], 1, Hp)
    lnc_g = pad2(params["lnc_g"], 1, Dp)
    lnc_b = pad2(params["lnc_b"], 1, Dp)
    on_g = pad2(params["on_g"], 1, Op)
    on_b = pad2(params["on_b"], 1, Op)

    if fuse_stage2:
        w2bd = jnp.concatenate(
            [jnp.concatenate([pad2(params["w2"], Hp, Op),
                              jnp.zeros((Hp, Op), jnp.float32)], axis=1),
             jnp.concatenate([jnp.zeros((Dp, Op), jnp.float32),
                              pad2(params["wc2"], Dp, Op)], axis=1)],
            axis=0).astype(jnp.bfloat16)
        stage2 = [w2bd]
    else:
        w2p = pad2(params["w2"], Hp, Op).astype(jnp.bfloat16)
        wc2p = pad2(params["wc2"], Dp, Op).astype(jnp.bfloat16)
        stage2 = [w2p, wc2p]

    ordered = [wcat, bcat, ln1_g, ln1_b, lnc_g, lnc_b] + stage2 + [b2cat, on_g, on_b]

    # ---- batch tiling: multi-step, pipelined, megacore-parallel grid ----
    if tm is None:
        cap = 256 if gen == "v5e" else (512 if gen == "v7x" else 1024)
        tm = min(cap, _round_up(B, SUBLANE))
        if gen == "v7x":
            # >= 2 grid steps so the ("parallel",) axis shards across both TCs.
            tm = min(tm, max(SUBLANE, _round_up(-(-B // 2), SUBLANE)))
    tm = max(SUBLANE, (tm // SUBLANE) * SUBLANE)
    Bp = _round_up(B, tm)
    # x stays f32 and keeps its true feature width; only batch-pad when needed.
    x_in = x if Bp == B else jnp.pad(x, ((0, Bp - B), (0, 0)))

    kernel = _make_kernel(hidden=hidden, input_dim=Din, output_dim=Dout,
                          hp=Hp, dp=Dp, op=Op, fuse_stage2=fuse_stage2)

    # Explicit VMEM budget (constants + double-buffered I/O tiles + elementwise
    # working set + slack).  Keeps headroom inside v7x's 64 MiB physical VMEM.
    const_bytes = sum(int(a.size) * a.dtype.itemsize for a in ordered)
    io_bytes = 2 * tm * (Din * 4 + Op * jnp.dtype(out_dtype).itemsize)
    work_bytes = tm * (2 * (Hp + Dp) + 6 * Op) * 4
    cap_bytes = (64 << 20) if gen == "v7x" else (100 << 20)
    vmem_limit = int(max(32 << 20,
                         min(const_bytes + io_bytes + work_bytes + (8 << 20),
                             cap_bytes)))
    # TODO(synk): for very large Din/hidden (multi-MiB weights) add a K-tiling
    # grid axis ("arbitrary") with an f32 accumulator scratch instead of keeping
    # the fused weights fully resident.

    def build(single_buffer_consts):
        # Grid-invariant param blocks: never re-fetched; single-buffer them so
        # they don't pay for a useless second VMEM copy.
        kwargs = dict(pipeline_mode=pl.Buffered(1)) if single_buffer_consts else {}

        def const_spec(a):
            return pl.BlockSpec(a.shape, lambda i: (0, 0), **kwargs)

        return pl.pallas_call(
            kernel,
            out_shape=jax.ShapeDtypeStruct((Bp, Op), out_dtype),
            grid_spec=pltpu.PrefetchScalarGridSpec(
                num_scalar_prefetch=0,
                grid=(Bp // tm,),
                in_specs=[pl.BlockSpec((tm, Din), lambda i: (i, 0))]
                         + [const_spec(a) for a in ordered],
                out_specs=pl.BlockSpec((tm, Op), lambda i: (i, 0)),
            ),
            compiler_params=pltpu.CompilerParams(
                dimension_semantics=("parallel",),
                vmem_limit_bytes=vmem_limit,
            ),
            interpret=interpret,
        )

    try:
        out_p = build(True)(x_in, *ordered)
    except Exception:
        # Fallback: default (double-buffered) pipelining for the constant blocks.
        out_p = build(False)(x_in, *ordered)

    # Slice away batch + lane padding outside the kernel (lane-dense stores inside).
    return out_p[:B, :Dout]


def init_params(key, input_dim, output_dim):
    hidden = input_dim * 2
    keys = jax.random.split(key, 8)

    def lin(k, fan_in, fan_out):
        bound = 1.0 / math.sqrt(fan_in)
        kw, kb = jax.random.split(k)
        w = jax.random.uniform(kw, (fan_in, fan_out), jnp.float32, -bound, bound)
        b = jax.random.uniform(kb, (1, fan_out), jnp.float32, -bound, bound)
        return w, b

    w1, b1 = lin(keys[0], input_dim, hidden)
    w2, b2 = lin(keys[1], hidden, output_dim)
    wc1, bc1 = lin(keys[2], input_dim, input_dim)
    wc2, bc2 = lin(keys[3], input_dim, output_dim)
    wf, bf = lin(keys[4], input_dim, output_dim)

    return {
        "w1": w1, "b1": b1,
        "ln1_g": jnp.ones((1, hidden), jnp.float32),
        "ln1_b": jnp.zeros((1, hidden), jnp.float32),
        "w2": w2, "b2": b2,
        "wc1": wc1, "bc1": bc1,
        "lnc_g": jnp.ones((1, input_dim), jnp.float32),
        "lnc_b": jnp.zeros((1, input_dim), jnp.float32),
        "wc2": wc2, "bc2": bc2,
        "wf": wf, "bf": bf,
        "on_g": jnp.ones((1, output_dim), jnp.float32),
        "on_b": jnp.zeros((1, output_dim), jnp.float32),
    }


def reference_forward(x, p, matmul_dtype=jnp.float32):
    """Pure-JAX reference (eval mode, dropout = identity).

    `matmul_dtype` lets the reference mirror the kernel's bf16 matmul inputs
    (with f32 accumulation) so the comparison is apples-to-apples.
    """
    def mm(a, w):
        return jnp.dot(a.astype(matmul_dtype), w.astype(matmul_dtype),
                       preferred_element_type=jnp.float32)

    h = mm(x, p["w1"]) + p["b1"]
    h = _layernorm(h, p["ln1_g"], p["ln1_b"])
    h = _gelu_exact(h)
    transformed = mm(h, p["w2"]) + p["b2"]

    c = mm(x, p["wc1"]) + p["bc1"]
    c = _layernorm(c, p["lnc_g"], p["lnc_b"])
    c = _gelu_exact(c)
    context_gates = jax.nn.sigmoid(mm(c, p["wc2"]) + p["bc2"])

    feature_gates = jax.nn.sigmoid(mm(x, p["wf"]) + p["bf"])

    gate = 0.7 * context_gates + 0.3 * feature_gates
    return _layernorm(transformed * gate, p["on_g"], p["on_b"])


if __name__ == "__main__":
    input_dim = 32
    output_dim = 64
    batch = 8

    key = jax.random.PRNGKey(0)
    kx, kp = jax.random.split(key)
    x = jax.random.normal(kx, (batch, input_dim), jnp.float32)
    params = init_params(kp, input_dim, output_dim)

    out = jax.block_until_ready(style_transformer_forward(x, params))
    assert out.shape == (batch, output_dim)

    # Compare against a reference that uses the same bf16 matmul-input cast
    # (f32 accumulation); elementwise math is f32 in both paths.
    ref = reference_forward(x, params, matmul_dtype=jnp.bfloat16)
    max_err = float(jnp.max(jnp.abs(out - ref)))
    assert jnp.allclose(out, ref, atol=5e-3, rtol=5e-3), max_err

    # TODO(synk): Dropout(0.1) is implemented as identity (inference semantics);
    # training-mode stochastic masking is not reproduced.
    print("KERNEL_OK")
</pallas_src>

<mosaic_0001>
module attributes {stable_mosaic.version = 11 : i64} {
  func.func @kernel(%arg0: i32, %arg1: memref<8x32xf32, #tpu.memory_space<vmem>>, %arg2: memref<32x384xbf16, #tpu.memory_space<vmem>>, %arg3: memref<1x384xf32, #tpu.memory_space<vmem>>, %arg4: memref<1x128xf32, #tpu.memory_space<vmem>>, %arg5: memref<1x128xf32, #tpu.memory_space<vmem>>, %arg6: memref<1x128xf32, #tpu.memory_space<vmem>>, %arg7: memref<1x128xf32, #tpu.memory_space<vmem>>, %arg8: memref<256x256xbf16, #tpu.memory_space<vmem>>, %arg9: memref<1x256xf32, #tpu.memory_space<vmem>>, %arg10: memref<1x128xf32, #tpu.memory_space<vmem>>, %arg11: memref<1x128xf32, #tpu.memory_space<vmem>>, %arg12: memref<8x128xf32, #tpu.memory_space<vmem>>) attributes {dimension_semantics = [#tpu.dimension_semantics<parallel>], iteration_bounds = array<i64: 1>, scalar_prefetch = 0 : i64, scratch_operands = 0 : i64, tpu.core_type = #tpu.core_type<tc>, window_params = [{transform_indices = @transform_0, window_bounds = array<i64: 8, 32>}, {pipeline_mode = #tpu.pipeline_mode<synchronous>, transform_indices = @transform_1, window_bounds = array<i64: 32, 384>}, {pipeline_mode = #tpu.pipeline_mode<synchronous>, transform_indices = @transform_2, window_bounds = array<i64: 1, 384>}, {pipeline_mode = #tpu.pipeline_mode<synchronous>, transform_indices = @transform_3, window_bounds = array<i64: 1, 128>}, {pipeline_mode = #tpu.pipeline_mode<synchronous>, transform_indices = @transform_4, window_bounds = array<i64: 1, 128>}, {pipeline_mode = #tpu.pipeline_mode<synchronous>, transform_indices = @transform_5, window_bounds = array<i64: 1, 128>}, {pipeline_mode = #tpu.pipeline_mode<synchronous>, transform_indices = @transform_6, window_bounds = array<i64: 1, 128>}, {pipeline_mode = #tpu.pipeline_mode<synchronous>, transform_indices = @transform_7, window_bounds = array<i64: 256, 256>}, {pipeline_mode = #tpu.pipeline_mode<synchronous>, transform_indices = @transform_8, window_bounds = array<i64: 1, 256>}, {pipeline_mode = #tpu.pipeline_mode<synchronous>, transform_indices = @transform_9, window_bounds = array<i64: 1, 128>}, {pipeline_mode = #tpu.pipeline_mode<synchronous>, transform_indices = @transform_10, window_bounds = array<i64: 1, 128>}, {transform_indices = @transform_11, window_bounds = array<i64: 8, 128>}]} {
    %c0 = arith.constant 0 : index
    %c0_0 = arith.constant 0 : index
    %0 = vector.load %arg1[%c0, %c0_0] : memref<8x32xf32, #tpu.memory_space<vmem>>, vector<8x32xf32>
    %1 = arith.truncf %0 : vector<8x32xf32> to vector<8x32xbf16>
    %c0_1 = arith.constant 0 : index
    %c0_2 = arith.constant 0 : index
    %2 = vector.load %arg2[%c0_1, %c0_2] : memref<32x384xbf16, #tpu.memory_space<vmem>>, vector<32x384xbf16>
    %cst = arith.constant dense<0.000000e+00> : vector<8x384xf32>
    %3 = tpu.matmul %1, %2, %cst {dimension_numbers = #tpu.dot_dimension_numbers<[1], [0], [0], [1], [0, 0, 1, 1], [], []>} : vector<8x32xbf16>, vector<32x384xbf16>, vector<8x384xf32> -> vector<8x384xf32>
    %c0_3 = arith.constant 0 : index
    %c0_4 = arith.constant 0 : index
    %4 = vector.load %arg3[%c0_3, %c0_4] : memref<1x384xf32, #tpu.memory_space<vmem>>, vector<1x384xf32>
    %5 = vector.broadcast %4 : vector<1x384xf32> to vector<8x384xf32>
    %6 = arith.addf %3, %5 : vector<8x384xf32>
    %7 = vector.extract_strided_slice %6 {offsets = [0, 0], sizes = [8, 128], strides = [1, 1]} : vector<8x384xf32> to vector<8x128xf32>
    %8 = vector.extract_strided_slice %6 {offsets = [0, 128], sizes = [8, 128], strides = [1, 1]} : vector<8x384xf32> to vector<8x128xf32>
    %9 = vector.extract_strided_slice %6 {offsets = [0, 256], sizes = [8, 128], strides = [1, 1]} : vector<8x384xf32> to vector<8x128xf32>
    %c0_5 = arith.constant 0 : index
    %c0_6 = arith.constant 0 : index
    %10 = vector.load %arg4[%c0_5, %c0_6] : memref<1x128xf32, #tpu.memory_space<vmem>>, vector<1x128xf32>
    %c0_7 = arith.constant 0 : index
    %c0_8 = arith.constant 0 : index
    %11 = vector.load %arg5[%c0_7, %c0_8] : memref<1x128xf32, #tpu.memory_space<vmem>>, vector<1x128xf32>
    %cst_9 = arith.constant dense<0.000000e+00> : vector<8xf32>
    %12 = vector.multi_reduction <add>, %7, %cst_9 [1] : vector<8x128xf32> to vector<8xf32>
    %13 = vector.shape_cast %12 : vector<8xf32> to vector<8x1xf32>
    %cst_10 = arith.constant 1.562500e-02 : f32
    %14 = vector.broadcast %cst_10 : f32 to vector<8x1xf32>
    %15 = arith.mulf %13, %14 : vector<8x1xf32>
    %16 = arith.mulf %7, %7 : vector<8x128xf32>
    %cst_11 = arith.constant dense<0.000000e+00> : vector<8xf32>
    %17 = vector.multi_reduction <add>, %16, %cst_11 [1] : vector<8x128xf32> to vector<8xf32>
    %18 = vector.shape_cast %17 : vector<8xf32> to vector<8x1xf32>
    %cst_12 = arith.constant 1.562500e-02 : f32
    %19 = vector.broadcast %cst_12 : f32 to vector<8x1xf32>
    %20 = arith.mulf %18, %19 : vector<8x1xf32>
    %21 = arith.mulf %15, %15 : vector<8x1xf32>
    %22 = arith.subf %20, %21 : vector<8x1xf32>
    %cst_13 = arith.constant 0.000000e+00 : f32
    %23 = vector.broadcast %cst_13 : f32 to vector<8x1xf32>
    %24 = arith.maximumf %22, %23 : vector<8x1xf32>
    %25 = vector.broadcast %15 : vector<8x1xf32> to vector<8x128xf32>
    %26 = arith.subf %7, %25 : vector<8x128xf32>
    %cst_14 = arith.constant 9.99999974E-6 : f32
    %27 = vector.broadcast %cst_14 : f32 to vector<8x1xf32>
    %28 = arith.addf %24, %27 : vector<8x1xf32>
    %29 = math.rsqrt %28 : vector<8x1xf32>
    %30 = vector.broadcast %29 : vector<8x1xf32> to vector<8x128xf32>
    %31 = arith.mulf %26, %30 : vector<8x128xf32>
    %32 = vector.broadcast %10 : vector<1x128xf32> to vector<8x128xf32>
    %33 = arith.mulf %31, %32 : vector<8x128xf32>
    %34 = vector.broadcast %11 : vector<1x128xf32> to vector<8x128xf32>
    %35 = arith.addf %33, %34 : vector<8x128xf32>
    %cst_15 = arith.constant 5.000000e-01 : f32
    %36 = vector.broadcast %cst_15 : f32 to vector<8x128xf32>
    %37 = arith.mulf %36, %35 : vector<8x128xf32>
    %cst_16 = arith.constant 0.707106769 : f32
    %38 = vector.broadcast %cst_16 : f32 to vector<8x128xf32>
    %39 = arith.mulf %35, %38 : vector<8x128xf32>
    %40 = math.erf %39 : vector<8x128xf32>
    %cst_17 = arith.constant 1.000000e+00 : f32
    %41 = vector.broadcast %cst_17 : f32 to vector<8x128xf32>
    %42 = arith.addf %41, %40 : vector<8x128xf32>
    %43 = arith.mulf %37, %42 : vector<8x128xf32>
    %c0_18 = arith.constant 0 : index
    %c0_19 = arith.constant 0 : index
    %44 = vector.load %arg6[%c0_18, %c0_19] : memref<1x128xf32, #tpu.memory_space<vmem>>, vector<1x128xf32>
    %c0_20 = arith.constant 0 : index
    %c0_21 = arith.constant 0 : index
    %45 = vector.load %arg7[%c0_20, %c0_21] : memref<1x128xf32, #tpu.memory_space<vmem>>, vector<1x128xf32>
    %cst_22 = arith.constant dense<0.000000e+00> : vector<8xf32>
    %46 = vector.multi_reduction <add>, %8, %cst_22 [1] : vector<8x128xf32> to vector<8xf32>
    %47 = vector.shape_cast %46 : vector<8xf32> to vector<8x1xf32>
    %cst_23 = arith.constant 3.125000e-02 : f32
    %48 = vector.broadcast %cst_23 : f32 to vector<8x1xf32>
    %49 = arith.mulf %47, %48 : vector<8x1xf32>
    %50 = arith.mulf %8, %8 : vector<8x128xf32>
    %cst_24 = arith.constant dense<0.000000e+00> : vector<8xf32>
    %51 = vector.multi_reduction <add>, %50, %cst_24 [1] : vector<8x128xf32> to vector<8xf32>
    %52 = vector.shape_cast %51 : vector<8xf32> to vector<8x1xf32>
    %cst_25 = arith.constant 3.125000e-02 : f32
    %53 = vector.broadcast %cst_25 : f32 to vector<8x1xf32>
    %54 = arith.mulf %52, %53 : vector<8x1xf32>
    %55 = arith.mulf %49, %49 : vector<8x1xf32>
    %56 = arith.subf %54, %55 : vector<8x1xf32>
    %cst_26 = arith.constant 0.000000e+00 : f32
    %57 = vector.broadcast %cst_26 : f32 to vector<8x1xf32>
    %58 = arith.maximumf %56, %57 : vector<8x1xf32>
    %59 = vector.broadcast %49 : vector<8x1xf32> to vector<8x128xf32>
    %60 = arith.subf %8, %59 : vector<8x128xf32>
    %cst_27 = arith.constant 9.99999974E-6 : f32
    %61 = vector.broadcast %cst_27 : f32 to vector<8x1xf32>
    %62 = arith.addf %58, %61 : vector<8x1xf32>
    %63 = math.rsqrt %62 : vector<8x1xf32>
    %64 = vector.broadcast %63 : vector<8x1xf32> to vector<8x128xf32>
    %65 = arith.mulf %60, %64 : vector<8x128xf32>
    %66 = vector.broadcast %44 : vector<1x128xf32> to vector<8x128xf32>
    %67 = arith.mulf %65, %66 : vector<8x128xf32>
    %68 = vector.broadcast %45 : vector<1x128xf32> to vector<8x128xf32>
    %69 = arith.addf %67, %68 : vector<8x128xf32>
    %cst_28 = arith.constant 5.000000e-01 : f32
    %70 = vector.broadcast %cst_28 : f32 to vector<8x128xf32>
    %71 = arith.mulf %70, %69 : vector<8x128xf32>
    %cst_29 = arith.constant 0.707106769 : f32
    %72 = vector.broadcast %cst_29 : f32 to vector<8x128xf32>
    %73 = arith.mulf %69, %72 : vector<8x128xf32>
    %74 = math.erf %73 : vector<8x128xf32>
    %cst_30 = arith.constant 1.000000e+00 : f32
    %75 = vector.broadcast %cst_30 : f32 to vector<8x128xf32>
    %76 = arith.addf %75, %74 : vector<8x128xf32>
    %77 = arith.mulf %71, %76 : vector<8x128xf32>
    %78 = arith.truncf %43 : vector<8x128xf32> to vector<8x128xbf16>
    %79 = arith.truncf %77 : vector<8x128xf32> to vector<8x128xbf16>
    %c0_31 = arith.constant 0 : index
    %c0_32 = arith.constant 0 : index
    %80 = vector.load %arg9[%c0_31, %c0_32] : memref<1x256xf32, #tpu.memory_space<vmem>>, vector<1x256xf32>
    %81 = tpu.concatenate %78, %79 in 1 : vector<8x128xbf16>, vector<8x128xbf16> -> vector<8x256xbf16>
    %c0_33 = arith.constant 0 : index
    %c0_34 = arith.constant 0 : index
    %82 = vector.load %arg8[%c0_33, %c0_34] : memref<256x256xbf16, #tpu.memory_space<vmem>>, vector<256x256xbf16>
    %cst_35 = arith.constant dense<0.000000e+00> : vector<8x256xf32>
    %83 = tpu.matmul %81, %82, %cst_35 {dimension_numbers = #tpu.dot_dimension_numbers<[1], [0], [0], [1], [0, 0, 1, 1], [], []>} : vector<8x256xbf16>, vector<256x256xbf16>, vector<8x256xf32> -> vector<8x256xf32>
    %84 = vector.broadcast %80 : vector<1x256xf32> to vector<8x256xf32>
    %85 = arith.addf %83, %84 : vector<8x256xf32>
    %86 = vector.extract_strided_slice %85 {offsets = [0, 0], sizes = [8, 128], strides = [1, 1]} : vector<8x256xf32> to vector<8x128xf32>
    %87 = vector.extract_strided_slice %85 {offsets = [0, 128], sizes = [8, 128], strides = [1, 1]} : vector<8x256xf32> to vector<8x128xf32>
    %cst_36 = arith.constant 5.000000e-01 : f32
    %88 = vector.broadcast %cst_36 : f32 to vector<8x128xf32>
    %89 = arith.mulf %88, %87 : vector<8x128xf32>
    %90 = math.tanh %89 : vector<8x128xf32>
    %cst_37 = arith.constant 1.000000e+00 : f32
    %91 = vector.broadcast %cst_37 : f32 to vector<8x128xf32>
    %92 = arith.addf %90, %91 : vector<8x128xf32>
    %cst_38 = arith.constant 5.000000e-01 : f32
    %93 = vector.broadcast %cst_38 : f32 to vector<8x128xf32>
    %94 = arith.mulf %93, %92 : vector<8x128xf32>
    %cst_39 = arith.constant 5.000000e-01 : f32
    %95 = vector.broadcast %cst_39 : f32 to vector<8x128xf32>
    %96 = arith.mulf %95, %9 : vector<8x128xf32>
    %97 = math.tanh %96 : vector<8x128xf32>
    %cst_40 = arith.constant 1.000000e+00 : f32
    %98 = vector.broadcast %cst_40 : f32 to vector<8x128xf32>
    %99 = arith.addf %97, %98 : vector<8x128xf32>
    %cst_41 = arith.constant 5.000000e-01 : f32
    %100 = vector.broadcast %cst_41 : f32 to vector<8x128xf32>
    %101 = arith.mulf %100, %99 : vector<8x128xf32>
    %cst_42 = arith.constant 0.699999988 : f32
    %102 = vector.broadcast %cst_42 : f32 to vector<8x128xf32>
    %103 = arith.mulf %102, %94 : vector<8x128xf32>
    %cst_43 = arith.constant 3.000000e-01 : f32
    %104 = vector.broadcast %cst_43 : f32 to vector<8x128xf32>
    %105 = arith.mulf %104, %101 : vector<8x128xf32>
    %106 = arith.addf %103, %105 : vector<8x128xf32>
    %107 = arith.mulf %86, %106 : vector<8x128xf32>
    %c0_44 = arith.constant 0 : index
    %c0_45 = arith.constant 0 : index
    %108 = vector.load %arg10[%c0_44, %c0_45] : memref<1x128xf32, #tpu.memory_space<vmem>>, vector<1x128xf32>
    %c0_46 = arith.constant 0 : index
    %c0_47 = arith.constant 0 : index
    %109 = vector.load %arg11[%c0_46, %c0_47] : memref<1x128xf32, #tpu.memory_space<vmem>>, vector<1x128xf32>
    %cst_48 = arith.constant dense<0.000000e+00> : vector<8xf32>
    %110 = vector.multi_reduction <add>, %107, %cst_48 [1] : vector<8x128xf32> to vector<8xf32>
    %111 = vector.shape_cast %110 : vector<8xf32> to vector<8x1xf32>
    %cst_49 = arith.constant 1.562500e-02 : f32
    %112 = vector.broadcast %cst_49 : f32 to vector<8x1xf32>
    %113 = arith.mulf %111, %112 : vector<8x1xf32>
    %114 = arith.mulf %107, %107 : vector<8x128xf32>
    %cst_50 = arith.constant dense<0.000000e+00> : vector<8xf32>
    %115 = vector.multi_reduction <add>, %114, %cst_50 [1] : vector<8x128xf32> to vector<8xf32>
    %116 = vector.shape_cast %115 : vector<8xf32> to vector<8x1xf32>
    %cst_51 = arith.constant 1.562500e-02 : f32
    %117 = vector.broadcast %cst_51 : f32 to vector<8x1xf32>
    %118 = arith.mulf %116, %117 : vector<8x1xf32>
    %119 = arith.mulf %113, %113 : vector<8x1xf32>
    %120 = arith.subf %118, %119 : vector<8x1xf32>
    %cst_52 = arith.constant 0.000000e+00 : f32
    %121 = vector.broadcast %cst_52 : f32 to vector<8x1xf32>
    %122 = arith.maximumf %120, %121 : vector<8x1xf32>
    %123 = vector.broadcast %113 : vector<8x1xf32> to vector<8x128xf32>
    %124 = arith.subf %107, %123 : vector<8x128xf32>
    %cst_53 = arith.constant 9.99999974E-6 : f32
    %125 = vector.broadcast %cst_53 : f32 to vector<8x1xf32>
    %126 = arith.addf %122, %125 : vector<8x1xf32>
    %127 = math.rsqrt %126 : vector<8x1xf32>
    %128 = vector.broadcast %127 : vector<8x1xf32> to vector<8x128xf32>
    %129 = arith.mulf %124, %128 : vector<8x128xf32>
    %130 = vector.broadcast %108 : vector<1x128xf32> to vector<8x128xf32>
    %131 = arith.mulf %129, %130 : vector<8x128xf32>
    %132 = vector.broadcast %109 : vector<1x128xf32> to vector<8x128xf32>
    %133 = arith.addf %131, %132 : vector<8x128xf32>
    %c0_54 = arith.constant 0 : index
    %c0_55 = arith.constant 0 : index
    %134 = vector.load %arg12[%c0_54, %c0_55] : memref<8x128xf32, #tpu.memory_space<vmem>>, vector<8x128xf32>
    tpu.vector_store %arg12[%c0_54, %c0_55], %133 {strides = array<i32>} : memref<8x128xf32, #tpu.memory_space<vmem>>, vector<8x128xf32>,
    return
  }
  func.func @transform_0(%arg0: i32) -> (i32, i32) {
    %c0_i32 = arith.constant 0 : i32
    %c0_i32_0 = arith.constant 0 : i32
    return %arg0, %c0_i32 : i32, i32
  }
  func.func @transform_1(%arg0: i32) -> (i32, i32) {
    %c0_i32 = arith.constant 0 : i32
    %c0_i32_0 = arith.constant 0 : i32
    %c0_i32_1 = arith.constant 0 : i32
    return %c0_i32, %c0_i32_0 : i32, i32
  }
  func.func @transform_2(%arg0: i32) -> (i32, i32) {
    %c0_i32 = arith.constant 0 : i32
    %c0_i32_0 = arith.constant 0 : i32
    %c0_i32_1 = arith.constant 0 : i32
    return %c0_i32, %c0_i32_0 : i32, i32
  }
  func.func @transform_3(%arg0: i32) -> (i32, i32) {
    %c0_i32 = arith.constant 0 : i32
    %c0_i32_0 = arith.constant 0 : i32
    %c0_i32_1 = arith.constant 0 : i32
    return %c0_i32, %c0_i32_0 : i32, i32
  }
  func.func @transform_4(%arg0: i32) -> (i32, i32) {
    %c0_i32 = arith.constant 0 : i32
    %c0_i32_0 = arith.constant 0 : i32
    %c0_i32_1 = arith.constant 0 : i32
    return %c0_i32, %c0_i32_0 : i32, i32
  }
  func.func @transform_5(%arg0: i32) -> (i32, i32) {
    %c0_i32 = arith.constant 0 : i32
    %c0_i32_0 = arith.constant 0 : i32
    %c0_i32_1 = arith.constant 0 : i32
    return %c0_i32, %c0_i32_0 : i32, i32
  }
  func.func @transform_6(%arg0: i32) -> (i32, i32) {
    %c0_i32 = arith.constant 0 : i32
    %c0_i32_0 = arith.constant 0 : i32
    %c0_i32_1 = arith.constant 0 : i32
    return %c0_i32, %c0_i32_0 : i32, i32
  }
  func.func @transform_7(%arg0: i32) -> (i32, i32) {
    %c0_i32 = arith.constant 0 : i32
    %c0_i32_0 = arith.constant 0 : i32
    %c0_i32_1 = arith.constant 0 : i32
    return %c0_i32, %c0_i32_0 : i32, i32
  }
  func.func @transform_8(%arg0: i32) -> (i32, i32) {
    %c0_i32 = arith.constant 0 : i32
    %c0_i32_0 = arith.constant 0 : i32
    %c0_i32_1 = arith.constant 0 : i32
    return %c0_i32, %c0_i32_0 : i32, i32
  }
  func.func @transform_9(%arg0: i32) -> (i32, i32) {
    %c0_i32 = arith.constant 0 : i32
    %c0_i32_0 = arith.constant 0 : i32
    %c0_i32_1 = arith.constant 0 : i32
    return %c0_i32, %c0_i32_0 : i32, i32
  }
  func.func @transform_10(%arg0: i32) -> (i32, i32) {
    %c0_i32 = arith.constant 0 : i32
    %c0_i32_0 = arith.constant 0 : i32
    %c0_i32_1 = arith.constant 0 : i32
    return %c0_i32, %c0_i32_0 : i32, i32
  }
  func.func @transform_11(%arg0: i32) -> (i32, i32) {
    %c0_i32 = arith.constant 0 : i32
    %c0_i32_0 = arith.constant 0 : i32
    return %arg0, %c0_i32 : i32, i32
  }
}

module attributes {stable_mosaic.version = 11 : i64} {
  func.func @kernel(%arg0: i32, %arg1: memref<8x32xf32, #tpu.memory_space<vmem>>, %arg2: memref<32x384xbf16, #tpu.memory_space<vmem>>, %arg3: memref<1x384xf32, #tpu.memory_space<vmem>>, %arg4: memref<1x128xf32, #tpu.memory_space<vmem>>, %arg5: memref<1x128xf32, #tpu.memory_space<vmem>>, %arg6: memref<1x128xf32, #tpu.memory_space<vmem>>, %arg7: memref<1x128xf32, #tpu.memory_space<vmem>>, %arg8: memref<256x256xbf16, #tpu.memory_space<vmem>>, %arg9: memref<1x256xf32, #tpu.memory_space<vmem>>, %arg10: memref<1x128xf32, #tpu.memory_space<vmem>>, %arg11: memref<1x128xf32, #tpu.memory_space<vmem>>, %arg12: memref<8x128xf32, #tpu.memory_space<vmem>>) attributes {dimension_semantics = [#tpu.dimension_semantics<parallel>], iteration_bounds = array<i64: 1>, scalar_prefetch = 0 : i64, scratch_operands = 0 : i64, tpu.core_type = #tpu.core_type<tc>, window_params = [{transform_indices = @transform_0, window_bounds = array<i64: 8, 32>}, {pipeline_mode = #tpu.pipeline_mode<synchronous>, transform_indices = @transform_1, window_bounds = array<i64: 32, 384>}, {pipeline_mode = #tpu.pipeline_mode<synchronous>, transform_indices = @transform_2, window_bounds = array<i64: 1, 384>}, {pipeline_mode = #tpu.pipeline_mode<synchronous>, transform_indices = @transform_3, window_bounds = array<i64: 1, 128>}, {pipeline_mode = #tpu.pipeline_mode<synchronous>, transform_indices = @transform_4, window_bounds = array<i64: 1, 128>}, {pipeline_mode = #tpu.pipeline_mode<synchronous>, transform_indices = @transform_5, window_bounds = array<i64: 1, 128>}, {pipeline_mode = #tpu.pipeline_mode<synchronous>, transform_indices = @transform_6, window_bounds = array<i64: 1, 128>}, {pipeline_mode = #tpu.pipeline_mode<synchronous>, transform_indices = @transform_7, window_bounds = array<i64: 256, 256>}, {pipeline_mode = #tpu.pipeline_mode<synchronous>, transform_indices = @transform_8, window_bounds = array<i64: 1, 256>}, {pipeline_mode = #tpu.pipeline_mode<synchronous>, transform_indices = @transform_9, window_bounds = array<i64: 1, 128>}, {pipeline_mode = #tpu.pipeline_mode<synchronous>, transform_indices = @transform_10, window_bounds = array<i64: 1, 128>}, {transform_indices = @transform_11, window_bounds = array<i64: 8, 128>}]} {
    %c0 = arith.constant 0 : index
    %c0_0 = arith.constant 0 : index
    %0 = vector.load %arg1[%c0, %c0_0] : memref<8x32xf32, #tpu.memory_space<vmem>>, vector<8x32xf32>
    %1 = arith.truncf %0 : vector<8x32xf32> to vector<8x32xbf16>
    %c0_1 = arith.constant 0 : index
    %c0_2 = arith.constant 0 : index
    %2 = vector.load %arg2[%c0_1, %c0_2] : memref<32x384xbf16, #tpu.memory_space<vmem>>, vector<32x384xbf16>
    %cst = arith.constant dense<0.000000e+00> : vector<8x384xf32>
    %3 = tpu.matmul %1, %2, %cst {dimension_numbers = #tpu.dot_dimension_numbers<[1], [0], [0], [1], [0, 0, 1, 1], [], []>} : vector<8x32xbf16>, vector<32x384xbf16>, vector<8x384xf32> -> vector<8x384xf32>
    %c0_3 = arith.constant 0 : index
    %c0_4 = arith.constant 0 : index
    %4 = vector.load %arg3[%c0_3, %c0_4] : memref<1x384xf32, #tpu.memory_space<vmem>>, vector<1x384xf32>
    %5 = vector.broadcast %4 : vector<1x384xf32> to vector<8x384xf32>
    %6 = arith.addf %3, %5 : vector<8x384xf32>
    %7 = vector.extract_strided_slice %6 {offsets = [0, 0], sizes = [8, 128], strides = [1, 1]} : vector<8x384xf32> to vector<8x128xf32>
    %8 = vector.extract_strided_slice %6 {offsets = [0, 128], sizes = [8, 128], strides = [1, 1]} : vector<8x384xf32> to vector<8x128xf32>
    %9 = vector.extract_strided_slice %6 {offsets = [0, 256], sizes = [8, 128], strides = [1, 1]} : vector<8x384xf32> to vector<8x128xf32>
    %c0_5 = arith.constant 0 : index
    %c0_6 = arith.constant 0 : index
    %10 = vector.load %arg4[%c0_5, %c0_6] : memref<1x128xf32, #tpu.memory_space<vmem>>, vector<1x128xf32>
    %c0_7 = arith.constant 0 : index
    %c0_8 = arith.constant 0 : index
    %11 = vector.load %arg5[%c0_7, %c0_8] : memref<1x128xf32, #tpu.memory_space<vmem>>, vector<1x128xf32>
    %cst_9 = arith.constant dense<0.000000e+00> : vector<8xf32>
    %12 = vector.multi_reduction <add>, %7, %cst_9 [1] : vector<8x128xf32> to vector<8xf32>
    %13 = vector.shape_cast %12 : vector<8xf32> to vector<8x1xf32>
    %cst_10 = arith.constant 1.562500e-02 : f32
    %14 = vector.broadcast %cst_10 : f32 to vector<8x1xf32>
    %15 = arith.mulf %13, %14 : vector<8x1xf32>
    %16 = arith.mulf %7, %7 : vector<8x128xf32>
    %cst_11 = arith.constant dense<0.000000e+00> : vector<8xf32>
    %17 = vector.multi_reduction <add>, %16, %cst_11 [1] : vector<8x128xf32> to vector<8xf32>
    %18 = vector.shape_cast %17 : vector<8xf32> to vector<8x1xf32>
    %cst_12 = arith.constant 1.562500e-02 : f32
    %19 = vector.broadcast %cst_12 : f32 to vector<8x1xf32>
    %20 = arith.mulf %18, %19 : vector<8x1xf32>
    %21 = arith.mulf %15, %15 : vector<8x1xf32>
    %22 = arith.subf %20, %21 : vector<8x1xf32>
    %cst_13 = arith.constant 0.000000e+00 : f32
    %23 = vector.broadcast %cst_13 : f32 to vector<8x1xf32>
    %24 = arith.maximumf %22, %23 : vector<8x1xf32>
    %25 = vector.broadcast %15 : vector<8x1xf32> to vector<8x128xf32>
    %26 = arith.subf %7, %25 : vector<8x128xf32>
    %cst_14 = arith.constant 9.99999974E-6 : f32
    %27 = vector.broadcast %cst_14 : f32 to vector<8x1xf32>
    %28 = arith.addf %24, %27 : vector<8x1xf32>
    %29 = math.rsqrt %28 : vector<8x1xf32>
    %30 = vector.broadcast %29 : vector<8x1xf32> to vector<8x128xf32>
    %31 = arith.mulf %26, %30 : vector<8x128xf32>
    %32 = vector.broadcast %10 : vector<1x128xf32> to vector<8x128xf32>
    %33 = arith.mulf %31, %32 : vector<8x128xf32>
    %34 = vector.broadcast %11 : vector<1x128xf32> to vector<8x128xf32>
    %35 = arith.addf %33, %34 : vector<8x128xf32>
    %cst_15 = arith.constant 5.000000e-01 : f32
    %36 = vector.broadcast %cst_15 : f32 to vector<8x128xf32>
    %37 = arith.mulf %36, %35 : vector<8x128xf32>
    %cst_16 = arith.constant 0.707106769 : f32
    %38 = vector.broadcast %cst_16 : f32 to vector<8x128xf32>
    %39 = arith.mulf %35, %38 : vector<8x128xf32>
    %40 = math.erf %39 : vector<8x128xf32>
    %cst_17 = arith.constant 1.000000e+00 : f32
    %41 = vector.broadcast %cst_17 : f32 to vector<8x128xf32>
    %42 = arith.addf %41, %40 : vector<8x128xf32>
    %43 = arith.mulf %37, %42 : vector<8x128xf32>
    %c0_18 = arith.constant 0 : index
    %c0_19 = arith.constant 0 : index
    %44 = vector.load %arg6[%c0_18, %c0_19] : memref<1x128xf32, #tpu.memory_space<vmem>>, vector<1x128xf32>
    %c0_20 = arith.constant 0 : index
    %c0_21 = arith.constant 0 : index
    %45 = vector.load %arg7[%c0_20, %c0_21] : memref<1x128xf32, #tpu.memory_space<vmem>>, vector<1x128xf32>
    %cst_22 = arith.constant dense<0.000000e+00> : vector<8xf32>
    %46 = vector.multi_reduction <add>, %8, %cst_22 [1] : vector<8x128xf32> to vector<8xf32>
    %47 = vector.shape_cast %46 : vector<8xf32> to vector<8x1xf32>
    %cst_23 = arith.constant 3.125000e-02 : f32
    %48 = vector.broadcast %cst_23 : f32 to vector<8x1xf32>
    %49 = arith.mulf %47, %48 : vector<8x1xf32>
    %50 = arith.mulf %8, %8 : vector<8x128xf32>
    %cst_24 = arith.constant dense<0.000000e+00> : vector<8xf32>
    %51 = vector.multi_reduction <add>, %50, %cst_24 [1] : vector<8x128xf32> to vector<8xf32>
    %52 = vector.shape_cast %51 : vector<8xf32> to vector<8x1xf32>
    %cst_25 = arith.constant 3.125000e-02 : f32
    %53 = vector.broadcast %cst_25 : f32 to vector<8x1xf32>
    %54 = arith.mulf %52, %53 : vector<8x1xf32>
    %55 = arith.mulf %49, %49 : vector<8x1xf32>
    %56 = arith.subf %54, %55 : vector<8x1xf32>
    %cst_26 = arith.constant 0.000000e+00 : f32
    %57 = vector.broadcast %cst_26 : f32 to vector<8x1xf32>
    %58 = arith.maximumf %56, %57 : vector<8x1xf32>
    %59 = vector.broadcast %49 : vector<8x1xf32> to vector<8x128xf32>
    %60 = arith.subf %8, %59 : vector<8x128xf32>
    %cst_27 = arith.constant 9.99999974E-6 : f32
    %61 = vector.broadcast %cst_27 : f32 to vector<8x1xf32>
    %62 = arith.addf %58, %61 : vector<8x1xf32>
    %63 = math.rsqrt %62 : vector<8x1xf32>
    %64 = vector.broadcast %63 : vector<8x1xf32> to vector<8x128xf32>
    %65 = arith.mulf %60, %64 : vector<8x128xf32>
    %66 = vector.broadcast %44 : vector<1x128xf32> to vector<8x128xf32>
    %67 = arith.mulf %65, %66 : vector<8x128xf32>
    %68 = vector.broadcast %45 : vector<1x128xf32> to vector<8x128xf32>
    %69 = arith.addf %67, %68 : vector<8x128xf32>
    %cst_28 = arith.constant 5.000000e-01 : f32
    %70 = vector.broadcast %cst_28 : f32 to vector<8x128xf32>
    %71 = arith.mulf %70, %69 : vector<8x128xf32>
    %cst_29 = arith.constant 0.707106769 : f32
    %72 = vector.broadcast %cst_29 : f32 to vector<8x128xf32>
    %73 = arith.mulf %69, %72 : vector<8x128xf32>
    %74 = math.erf %73 : vector<8x128xf32>
    %cst_30 = arith.constant 1.000000e+00 : f32
    %75 = vector.broadcast %cst_30 : f32 to vector<8x128xf32>
    %76 = arith.addf %75, %74 : vector<8x128xf32>
    %77 = arith.mulf %71, %76 : vector<8x128xf32>
    %78 = arith.truncf %43 : vector<8x128xf32> to vector<8x128xbf16>
    %79 = arith.truncf %77 : vector<8x128xf32> to vector<8x128xbf16>
    %c0_31 = arith.constant 0 : index
    %c0_32 = arith.constant 0 : index
    %80 = vector.load %arg9[%c0_31, %c0_32] : memref<1x256xf32, #tpu.memory_space<vmem>>, vector<1x256xf32>
    %81 = tpu.concatenate %78, %79 in 1 : vector<8x128xbf16>, vector<8x128xbf16> -> vector<8x256xbf16>
    %c0_33 = arith.constant 0 : index
    %c0_34 = arith.constant 0 : index
    %82 = vector.load %arg8[%c0_33, %c0_34] : memref<256x256xbf16, #tpu.memory_space<vmem>>, vector<256x256xbf16>
    %cst_35 = arith.constant dense<0.000000e+00> : vector<8x256xf32>
    %83 = tpu.matmul %81, %82, %cst_35 {dimension_numbers = #tpu.dot_dimension_numbers<[1], [0], [0], [1], [0, 0, 1, 1], [], []>} : vector<8x256xbf16>, vector<256x256xbf16>, vector<8x256xf32> -> vector<8x256xf32>
    %84 = vector.broadcast %80 : vector<1x256xf32> to vector<8x256xf32>
    %85 = arith.addf %83, %84 : vector<8x256xf32>
    %86 = vector.extract_strided_slice %85 {offsets = [0, 0], sizes = [8, 128], strides = [1, 1]} : vector<8x256xf32> to vector<8x128xf32>
    %87 = vector.extract_strided_slice %85 {offsets = [0, 128], sizes = [8, 128], strides = [1, 1]} : vector<8x256xf32> to vector<8x128xf32>
    %cst_36 = arith.constant 5.000000e-01 : f32
    %88 = vector.broadcast %cst_36 : f32 to vector<8x128xf32>
    %89 = arith.mulf %88, %87 : vector<8x128xf32>
    %90 = math.tanh %89 : vector<8x128xf32>
    %cst_37 = arith.constant 1.000000e+00 : f32
    %91 = vector.broadcast %cst_37 : f32 to vector<8x128xf32>
    %92 = arith.addf %90, %91 : vector<8x128xf32>
    %cst_38 = arith.constant 5.000000e-01 : f32
    %93 = vector.broadcast %cst_38 : f32 to vector<8x128xf32>
    %94 = arith.mulf %93, %92 : vector<8x128xf32>
    %cst_39 = arith.constant 5.000000e-01 : f32
    %95 = vector.broadcast %cst_39 : f32 to vector<8x128xf32>
    %96 = arith.mulf %95, %9 : vector<8x128xf32>
    %97 = math.tanh %96 : vector<8x128xf32>
    %cst_40 = arith.constant 1.000000e+00 : f32
    %98 = vector.broadcast %cst_40 : f32 to vector<8x128xf32>
    %99 = arith.addf %97, %98 : vector<8x128xf32>
    %cst_41 = arith.constant 5.000000e-01 : f32
    %100 = vector.broadcast %cst_41 : f32 to vector<8x128xf32>
    %101 = arith.mulf %100, %99 : vector<8x128xf32>
    %cst_42 = arith.constant 0.699999988 : f32
    %102 = vector.broadcast %cst_42 : f32 to vector<8x128xf32>
    %103 = arith.mulf %102, %94 : vector<8x128xf32>
    %cst_43 = arith.constant 3.000000e-01 : f32
    %104 = vector.broadcast %cst_43 : f32 to vector<8x128xf32>
    %105 = arith.mulf %104, %101 : vector<8x128xf32>
    %106 = arith.addf %103, %105 : vector<8x128xf32>
    %107 = arith.mulf %86, %106 : vector<8x128xf32>
    %c0_44 = arith.constant 0 : index
    %c0_45 = arith.constant 0 : index
    %108 = vector.load %arg10[%c0_44, %c0_45] : memref<1x128xf32, #tpu.memory_space<vmem>>, vector<1x128xf32>
    %c0_46 = arith.constant 0 : index
    %c0_47 = arith.constant 0 : index
    %109 = vector.load %arg11[%c0_46, %c0_47] : memref<1x128xf32, #tpu.memory_space<vmem>>, vector<1x128xf32>
    %cst_48 = arith.constant dense<0.000000e+00> : vector<8xf32>
    %110 = vector.multi_reduction <add>, %107, %cst_48 [1] : vector<8x128xf32> to vector<8xf32>
    %111 = vector.shape_cast %110 : vector<8xf32> to vector<8x1xf32>
    %cst_49 = arith.constant 1.562500e-02 : f32
    %112 = vector.broadcast %cst_49 : f32 to vector<8x1xf32>
    %113 = arith.mulf %111, %112 : vector<8x1xf32>
    %114 = arith.mulf %107, %107 : vector<8x128xf32>
    %cst_50 = arith.constant dense<0.000000e+00> : vector<8xf32>
    %115 = vector.multi_reduction <add>, %114, %cst_50 [1] : vector<8x128xf32> to vector<8xf32>
    %116 = vector.shape_cast %115 : vector<8xf32> to vector<8x1xf32>
    %cst_51 = arith.constant 1.562500e-02 : f32
    %117 = vector.broadcast %cst_51 : f32 to vector<8x1xf32>
    %118 = arith.mulf %116, %117 : vector<8x1xf32>
    %119 = arith.mulf %113, %113 : vector<8x1xf32>
    %120 = arith.subf %118, %119 : vector<8x1xf32>
    %cst_52 = arith.constant 0.000000e+00 : f32
    %121 = vector.broadcast %cst_52 : f32 to vector<8x1xf32>
    %122 = arith.maximumf %120, %121 : vector<8x1xf32>
    %123 = vector.broadcast %113 : vector<8x1xf32> to vector<8x128xf32>
    %124 = arith.subf %107, %123 : vector<8x128xf32>
    %cst_53 = arith.constant 9.99999974E-6 : f32
    %125 = vector.broadcast %cst_53 : f32 to vector<8x1xf32>
    %126 = arith.addf %122, %125 : vector<8x1xf32>
    %127 = math.rsqrt %126 : vector<8x1xf32>
    %128 = vector.broadcast %127 : vector<8x1xf32> to vector<8x128xf32>
    %129 = arith.mulf %124, %128 : vector<8x128xf32>
    %130 = vector.broadcast %108 : vector<1x128xf32> to vector<8x128xf32>
    %131 = arith.mulf %129, %130 : vector<8x128xf32>
    %132 = vector.broadcast %109 : vector<1x128xf32> to vector<8x128xf32>
    %133 = arith.addf %131, %132 : vector<8x128xf32>
    %c0_54 = arith.constant 0 : index
    %c0_55 = arith.constant 0 : index
    %134 = vector.load %arg12[%c0_54, %c0_55] : memref<8x128xf32, #tpu.memory_space<vmem>>, vector<8x128xf32>
    tpu.vector_store %arg12[%c0_54, %c0_55], %133 {strides = array<i32>} : memref<8x128xf32, #tpu.memory_space<vmem>>, vector<8x128xf32>,
    return
  }
  func.func @transform_0(%arg0: i32) -> (i32, i32) {
    %c0_i32 = arith.constant 0 : i32
    %c0_i32_0 = arith.constant 0 : i32
    return %arg0, %c0_i32 : i32, i32
  }
  func.func @transform_1(%arg0: i32) -> (i32, i32) {
    %c0_i32 = arith.constant 0 : i32
    %c0_i32_0 = arith.constant 0 : i32
    %c0_i32_1 = arith.constant 0 : i32
    return %c0_i32, %c0_i32_0 : i32, i32
  }
  func.func @transform_2(%arg0: i32) -> (i32, i32) {
    %c0_i32 = arith.constant 0 : i32
    %c0_i32_0 = arith.constant 0 : i32
    %c0_i32_1 = arith.constant 0 : i32
    return %c0_i32, %c0_i32_0 : i32, i32
  }
  func.func @transform_3(%arg0: i32) -> (i32, i32) {
    %c0_i32 = arith.constant 0 : i32
    %c0_i32_0 = arith.constant 0 : i32
    %c0_i32_1 = arith.constant 0 : i32
    return %c0_i32, %c0_i32_0 : i32, i32
  }
  func.func @transform_4(%arg0: i32) -> (i32, i32) {
    %c0_i32 = arith.constant 0 : i32
    %c0_i32_0 = arith.constant 0 : i32
    %c0_i32_1 = arith.constant 0 : i32
    return %c0_i32, %c0_i32_0 : i32, i32
  }
  func.func @transform_5(%arg0: i32) -> (i32, i32) {
    %c0_i32 = arith.constant 0 : i32
    %c0_i32_0 = arith.constant 0 : i32
    %c0_i32_1 = arith.constant 0 : i32
    return %c0_i32, %c0_i32_0 : i32, i32
  }
  func.func @transform_6(%arg0: i32) -> (i32, i32) {
    %c0_i32 = arith.constant 0 : i32
    %c0_i32_0 = arith.constant 0 : i32
    %c0_i32_1 = arith.constant 0 : i32
    return %c0_i32, %c0_i32_0 : i32, i32
  }
  func.func @transform_7(%arg0: i32) -> (i32, i32) {
    %c0_i32 = arith.constant 0 : i32
    %c0_i32_0 = arith.constant 0 : i32
    %c0_i32_1 = arith.constant 0 : i32
    return %c0_i32, %c0_i32_0 : i32, i32
  }
  func.func @transform_8(%arg0: i32) -> (i32, i32) {
    %c0_i32 = arith.constant 0 : i32
    %c0_i32_0 = arith.constant 0 : i32
    %c0_i32_1 = arith.constant 0 : i32
    return %c0_i32, %c0_i32_0 : i32, i32
  }
  func.func @transform_9(%arg0: i32) -> (i32, i32) {
    %c0_i32 = arith.constant 0 : i32
    %c0_i32_0 = arith.constant 0 : i32
    %c0_i32_1 = arith.constant 0 : i32
    return %c0_i32, %c0_i32_0 : i32, i32
  }
  func.func @transform_10(%arg0: i32) -> (i32, i32) {
    %c0_i32 = arith.constant 0 : i32
    %c0_i32_0 = arith.constant 0 : i32
    %c0_i32_1 = arith.constant 0 : i32
    return %c0_i32, %c0_i32_0 : i32, i32
  }
  func.func @transform_11(%arg0: i32) -> (i32, i32) {
    %c0_i32 = arith.constant 0 : i32
    %c0_i32_0 = arith.constant 0 : i32
    return %arg0, %c0_i32 : i32, i32
  }
}

</mosaic_0001>

<bundles_post_ra>
// kernel: tpu_custom_call.1
= control target key start
LH: loop header
LB: loop body
LE: loop exit
PB: predicated region body
PF: predicated region fallthrough
CT: control target
= control target key end

     0   :  { %16 = vsyncpa [#allocation3], 0  ;;  %s1003_s0 = inlined_call_operand.hbm [shape: f32[8,32], index: 0, kind: input, shape index: {}]   ;;  %s1004_s1 = inlined_call_operand.hbm [shape: bf16[32,384], index: 1, kind: input, shape index: {}]   ;;  %s1005_s2 = inlined_call_operand.vmem [shape: f32[1,384], index: 2, kind: input, shape index: {}]   ;;  %s1006_s3 = inlined_call_operand.hbm [shape: f32[1,128], index: 3, kind: input, shape index: {}]   ;;  %s1007_s4 = inlined_call_operand.vmem [shape: f32[1,128], index: 4, kind: input, shape index: {}]   ;;  %s1008_s5 = inlined_call_operand.vmem [shape: f32[1,128], index: 5, kind: input, shape index: {}]   ;;  %s1009_s6 = inlined_call_operand.vmem [shape: f32[1,128], index: 6, kind: input, shape index: {}]   ;;  %s1010_s7 = inlined_call_operand.hbm [shape: bf16[256,256], index: 7, kind: input, shape index: {}]   ;;  %s1011_s8 = inlined_call_operand.vmem [shape: f32[1,256], index: 8, kind: input, shape index: {}]   ;;  %s1012_s9 = inlined_call_operand.vmem [shape: f32[1,128], index: 9, kind: input, shape index: {}]   ;;  %s1013_s10 = inlined_call_operand.vmem [shape: f32[1,128], index: 10, kind: input, shape index: {}]   ;;  %s1014_s11 = inlined_call_operand.hbm [shape: f32[8,128], index: 11, kind: output, shape index: {}]  }
   0x1   :  { %17 = vsyncpa [#allocation6], 0 }
   0x2   :  { %18 = vsyncpa [#allocation9], 0 }
   0x3   :  { %19 = vsyncpa [#allocation4], 0  ;;  %s859_s17 = smov [#allocation5]  }
   0x4   :  { %s35_s18 = sshll.u32 %s859_s17, 4  ;;  %s36_s18 = int_to_ptr.vmem [resolvable:$true] %s35_s18 }
   0x5   :  { %s759_s19 = scalar_lea.vmem %s36_s18, 768  ;;  %p764_p1 = scmp.lt.s32.totalorder %s36_s18, %s36_s18 }
   0x6   :  { %p760_p0 = scmp.ne.s32.totalorder %s36_s18, %s759_s19  ;;  %p765_p2 = scmp.lt.s32.totalorder %s759_s19, %s759_s19 }
   0x8   :  { %p766_p3 = por %p765_p2, %p764_p1 }
   0xa   :  { %p767_p4 = pnand %p766_p3, %p760_p0 }
   0xc   :  { %770 = shalt.err (!%p767_p4)
}
   0xd   :  { %s860_s20 = smov 192   ;;  %s861_s21 = smov 12  }
   0xe   :  { %41 = dma.hbm_to_vmem [thread:$0]  %s1004_s1, 768, %s36_s18, [#allocation6], %s860_s20, %s860_s20, %s861_s21  }
   0xf   :  { %s862_s24 = smov [#allocation2]   ;;  %s863_s26 = smov [#allocation7]  }
  0x10   :  { %s26_s25 = sshll.u32 %s862_s24, 4  ;;  %s50_s27 = sshll.u32 %s863_s26, 4  ;;  %s27_s25 = int_to_ptr.vmem [resolvable:$true] %s26_s25  ;;  %s51_s27 = int_to_ptr.vmem [resolvable:$true] %s50_s27 }
  0x11   :  { %s779_s28 = scalar_lea.vmem %s27_s25, 128  ;;  %p784_p6 = scmp.lt.s32.totalorder %s27_s25, %s27_s25 }
  0x12   :  { %p780_p5 = scmp.ne.s32.totalorder %s27_s25, %s779_s28  ;;  %p785_p7 = scmp.lt.s32.totalorder %s779_s28, %s779_s28 }
  0x14   :  { %p786_p8 = por %p785_p7, %p784_p6 }
  0x16   :  { %p787_p9 = pnand %p786_p8, %p780_p5 }
  0x18   :  { %790 = shalt.err (!%p787_p9)
}
  0x19   :  { %29 = dma.hbm_to_vmem [thread:$0]  %s1003_s0, 128, %s27_s25, [#allocation3]  }
  0x1a   :  { %s799_s12 = scalar_lea.vmem %s51_s27, 16  ;;  %s803_s1 = scalar_lea.vmem %s51_s27, 32 }
  0x1b   :  { %p800_p10 = scmp.ne.s32.totalorder %s51_s27, %s799_s12  ;;  %p804_p11 = scmp.lt.s32.totalorder %s51_s27, %s51_s27 }
  0x1c   :  { %p805_p12 = scmp.lt.s32.totalorder %s803_s1, %s799_s12 }
  0x1e   :  { %p806_p13 = por %p805_p12, %p804_p11 }
  0x20   :  { %p807_p0 = pnand %p806_p13, %p800_p10 }
  0x22   :  { %810 = shalt.err (!%p807_p0)
}
  0x23   :  { %53 = dma.hbm_to_vmem [thread:$0]  %s1006_s3, 16, %s51_s27, [#allocation6]  }
  0x24   :  { %s864_s15 = smov [#allocation8]  }
  0x25   :  { %s65_s16 = sshll.u32 %s864_s15, 4  ;;  %s66_s16 = int_to_ptr.vmem [resolvable:$true] %s65_s16 }
  0x26   :  { %s819_s17 = scalar_lea.vmem %s66_s16, 4096  ;;  %p824_p2 = scmp.lt.s32.totalorder %s66_s16, %s66_s16 }
  0x27   :  { %p820_p1 = scmp.ne.s32.totalorder %s66_s16, %s819_s17  ;;  %p825_p3 = scmp.lt.s32.totalorder %s819_s17, %s819_s17 }
  0x29   :  { %p826_p4 = por %p825_p3, %p824_p2 }
  0x2b   :  { %p827_p5 = pnand %p826_p4, %p820_p1 }
  0x2d   :  { %830 = shalt.err (!%p827_p5)
}
  0x2e   :  { %s865_s0 = smov 128   ;;  %s866_s18 = smov 8  }
  0x2f   :  { %71 = dma.hbm_to_vmem [thread:$0]  %s1010_s7, 4096, %s66_s16, [#allocation9], %s865_s0, %s865_s0, %s866_s18  }
  0x30   :  { %851 = dma.done.wait [#allocation3], 128  }
  0x31   :  { %852 = vsyncadd [#allocation3], 4294967168 }
  0x32   :  { %853 = dma.done.wait [#allocation6], 784  }
  0x33   :  { %854 = vsyncadd [#allocation6], 4294966512 }
  0x34   :  { %855 = dma.done.wait [#allocation9], 4096  }
  0x35   :  { %856 = vsyncadd [#allocation9], 4294963200  ;;  %v867_v0 = vmov 0   ;;  %v681_v1 = vld [vmem:[#allocation5 + $0x1c] ss:$12 sps:$4 sm:$0xff]   ;;  %vm150_vm0 = vcmask 261120   ;;  %v103_v11 = vlaneseq }
  0x36   :  { %186 = vmatprep.mubr.bf16.mxu1 %v867_v0  ;;  %v683_v2 = vld [vmem:[#allocation5 + $0x18] ss:$12 sps:$4 sm:$0xff]   ;;  %166 = vmatprep.subr.bf16.mxu1 %v681_v1  ;;  %v686_v4 = vld [vmem:[#allocation5] ss:$12 sps:$4 sm:$0xff]   ;;  %v868_v39 = vmov 0.0   ;;  %vm869_vm1 = vmmov 0  }
  0x37   :  { %v684_v3 = vld [vmem:[#allocation5 + $0x4] ss:$12 sps:$4 sm:$0xff]   ;;  %167 = vmatpush1.bf16.msra.mxu1 %v683_v2  ;;  %v91_v5 = vld [vmem:[#allocation2] sm:$0xff]  ;;  %v947_v12 = vshrl.u32 %v103_v11, 7  ;;  %v728_v40 = vld [vmem:[#allocation5 + $0x20] ss:$12 sps:$4 sm:$0xff]  }
  0x38   :  { %168 = vmatprep.subr.bf16.mxu1 %v684_v3  ;;  %v943_v6 = vpack.c.bf16 %v91_v5, %v91_v5  ;;  %v687_v7 = vld [vmem:[#allocation8 + $0x74] ss:$8 sps:$4 sm:$0xff]   ;;  %v689_v8 = vld [vmem:[#allocation8 + $0x70] ss:$8 sps:$4 sm:$0xff]   ;;  %v690_v9 = vld [vmem:[#allocation8 + $0x64] ss:$8 sps:$4 sm:$0xff]  }
  0x39   :  { %511 = vmatprep.subr.bf16.mxu0 %v687_v7  ;;  %v692_v10 = vld [vmem:[#allocation8 + $0x60] ss:$8 sps:$4 sm:$0xff]   ;;  %v109_v13 = vsub.s32 1, %v947_v12  ;;  %v105_v14 = vsub.s32 0, %v947_v12  ;;  %v693_v26 = vld [vmem:[#allocation8 + $0x54] ss:$8 sps:$4 sm:$0xff]  }
  0x3a   :  { %512 = vmatpush1.bf16.msra.mxu0 %v689_v8  ;;  %v954_v15 = vld [vmem:[%s1005_s2] sm:$0x7]  ;;  %v695_v27 = vld [vmem:[#allocation8 + $0x50] ss:$8 sps:$4 sm:$0xff]   ;;  %v699_v30 = vld [vmem:[#allocation8 + $0x34] ss:$8 sps:$4 sm:$0xff]  }
  0x3b   :  { %169 = vmatpush1.bf16.msra.mxu1 %v686_v4  ;;  %513 = vmatprep.subr.bf16.mxu0 %v690_v9  ;;  %v110_v16 = vrot.slane %v954_v15, %v109_v13  ;;  %v106_v18 = vrot.slane %v954_v15, %v105_v14  ;;  %v696_v28 = vld [vmem:[#allocation8 + $0x44] ss:$8 sps:$4 sm:$0xff]   ;;  %v698_v29 = vld [vmem:[#allocation8 + $0x40] ss:$8 sps:$4 sm:$0xff]   ;;  %v701_v31 = vld [vmem:[#allocation8 + $0x30] ss:$8 sps:$4 sm:$0xff]  }
  0x3c   :  { %v702_v32 = vld [vmem:[#allocation8 + $0x24] ss:$8 sps:$4 sm:$0xff]   ;;  %v704_v33 = vld [vmem:[#allocation8 + $0x20] ss:$8 sps:$4 sm:$0xff]   ;;  %v705_v34 = vld [vmem:[#allocation8 + $0x14] ss:$8 sps:$4 sm:$0xff]   ;;  %661 = vmatprep.subr.bf16.mxu1 %v868_v39 }
  0x3d   :  { %v707_v35 = vld [vmem:[#allocation8 + $0x10] ss:$8 sps:$4 sm:$0xff]   ;;  %v708_v36 = vld [vmem:[#allocation8 + $0x4] ss:$8 sps:$4 sm:$0xff]   ;;  %v710_v37 = vld [vmem:[#allocation8] ss:$8 sps:$4 sm:$0xff]  }
  0x3e   :  { %618 = vmatmul.mubr.msk.bf16.vlgmr.msra.gmra.mxu1 %vm150_vm0, %v943_v6  ;;  %514 = vmatpush1.bf16.msra.mxu0 %v692_v10  ;;  %v711_v38 = vld [vmem:[#allocation8 + $0xf4] ss:$8 sps:$4 sm:$0xff]   ;;  %v713_v41 = vld [vmem:[#allocation8 + $0xf0] ss:$8 sps:$4 sm:$0xff]   ;;  %v714_v43 = vld [vmem:[#allocation8 + $0xe4] ss:$8 sps:$4 sm:$0xff]  }
  0x3f   :  { %515 = vmatprep.subr.bf16.mxu0 %v693_v26  ;;  %665 = vmatprep.mubr.msk.bf16.mxu1 %vm869_vm1, %v868_v39  ;;  %v732_v42 = vld [vmem:[#allocation5 + $0x8] ss:$12 sps:$4 sm:$0xff]   ;;  %v622_v11 = vld [vmem:[%s1008_s5] ss:$0 sm:$0xff]  ;;  %s870_s28 = smov [#allocation10]  }
  0x40   :  { %662 = vmatpush3.bf16.msra.mxu1 %v728_v40  ;;  %v716_v44 = vld [vmem:[#allocation8 + $0xe0] ss:$8 sps:$4 sm:$0xff]   ;;  %v717_v45 = vld [vmem:[#allocation8 + $0xd4] ss:$8 sps:$4 sm:$0xff]   ;;  %v719_v46 = vld [vmem:[#allocation8 + $0xd0] ss:$8 sps:$4 sm:$0xff]  }
  0x41   :  { %663 = vmatprep.subr.bf16.mxu1 %v868_v39  ;;  %v720_v47 = vld [vmem:[#allocation8 + $0xc4] ss:$8 sps:$4 sm:$0xff]   ;;  %v722_v48 = vld [vmem:[#allocation8 + $0xc0] ss:$8 sps:$4 sm:$0xff]   ;;  %v723_v49 = vld [vmem:[#allocation8 + $0xb4] ss:$8 sps:$4 sm:$0xff]  }
  0x42   :  { %516 = vmatpush1.bf16.msra.mxu0 %v695_v27  ;;  %v725_v50 = vld [vmem:[#allocation8 + $0xb0] ss:$8 sps:$4 sm:$0xff]   ;;  %v726_v51 = vld [vmem:[#allocation8 + $0xa4] ss:$8 sps:$4 sm:$0xff]   ;;  %v729_v52 = vld [vmem:[#allocation8 + $0xa0] ss:$8 sps:$4 sm:$0xff]  }
  0x43   :  { %517 = vmatprep.subr.bf16.mxu0 %v696_v28  ;;  %v730_v53 = vld [vmem:[#allocation8 + $0x94] ss:$8 sps:$4 sm:$0xff]   ;;  %v733_v54 = vld [vmem:[#allocation8 + $0x90] ss:$8 sps:$4 sm:$0xff]   ;;  %v734_v55 = vld [vmem:[#allocation8 + $0x84] ss:$8 sps:$4 sm:$0xff]  }
  0x44   :  { %664 = vmatpush3.bf16.msra.mxu1 %v732_v42  ;;  %v736_v56 = vld [vmem:[#allocation8 + $0x80] ss:$8 sps:$4 sm:$0xff]   ;;  %s601_s29 = sshll.u32 %s870_s28, 4  ;;  %s602_s29 = int_to_ptr.vmem [resolvable:$true] %s601_s29 }
  0x45   :  { %s831_s30 = scalar_lea.vmem %s602_s29, 128  ;;  %p836_p7 = scmp.lt.s32.totalorder %s602_s29, %s602_s29 }
  0x46   :  { %518 = vmatpush1.bf16.msra.mxu0 %v698_v29  ;;  %p832_p6 = scmp.ne.s32.totalorder %s602_s29, %s831_s30  ;;  %p837_p8 = scmp.lt.s32.totalorder %s831_s30, %s831_s30 }
  0x47   :  { %519 = vmatprep.subr.bf16.mxu0 %v699_v30  ;;  %666 = vmatmul.mubr.msk.bf16.vlgmr.msra.gmra.mxu1 %vm150_vm0, %v943_v6 }
  0x48   :  { %p838_p9 = por %p837_p8, %p836_p7 }
  0x4a   :  { %520 = vmatpush1.bf16.msra.mxu0 %v701_v31  ;;  %p839_p10 = pnand %p838_p9, %p832_p6 }
  0x4b   :  { %521 = vmatprep.subr.bf16.mxu0 %v702_v32 }
  0x4e   :  { %522 = vmatpush1.bf16.msra.mxu0 %v704_v33 }
  0x4f   :  { %523 = vmatprep.subr.bf16.mxu0 %v705_v34 }
  0x52   :  { %524 = vmatpush1.bf16.msra.mxu0 %v707_v35 }
  0x53   :  { %525 = vmatprep.subr.bf16.mxu0 %v708_v36 }
  0x56   :  { %526 = vmatpush1.bf16.msra.mxu0 %v710_v37 }
  0x57   :  { %527 = vmatprep.subr.bf16.mxu0 %v711_v38 }
  0x5a   :  { %528 = vmatpush2.bf16.msra.mxu0 %v713_v41 }
  0x5b   :  { %529 = vmatprep.subr.bf16.mxu0 %v714_v43  ;;  %v113_v43 = vsub.s32 2, %v947_v12 }
  0x5e   :  { %530 = vmatpush2.bf16.msra.mxu0 %v716_v44  ;;  %v114_v44 = vrot.slane %v954_v15, %v113_v43 }
  0x5f   :  { %531 = vmatprep.subr.bf16.mxu0 %v717_v45 }
  0x62   :  { %532 = vmatpush2.bf16.msra.mxu0 %v719_v46 }
  0x63   :  { %533 = vmatprep.subr.bf16.mxu0 %v720_v47  ;;  %v307_v47 = vld [vmem:[%s1011_s8] sm:$0x3] }
  0x66   :  { %534 = vmatpush2.bf16.msra.mxu0 %v722_v48  ;;  %v348_v48 = vrot.slane %v307_v47, %v109_v13 }
  0x67   :  { %535 = vmatprep.subr.bf16.mxu0 %v723_v49 }
  0x6a   :  { %536 = vmatpush2.bf16.msra.mxu0 %v725_v50 }
  0x6b   :  { %537 = vmatprep.subr.bf16.mxu0 %v726_v51 }
  0x6e   :  { %538 = vmatpush2.bf16.msra.mxu0 %v729_v52 }
  0x6f   :  { %539 = vmatprep.subr.bf16.mxu0 %v730_v53 }
  0x72   :  { %540 = vmatpush2.bf16.msra.mxu0 %v733_v54 }
  0x73   :  { %541 = vmatprep.subr.bf16.mxu0 %v734_v55 }
  0x76   :  { %542 = vmatpush2.bf16.msra.mxu0 %v736_v56 }
  0xfe   :  { %v188_v17 = vpop.f32.mrf.mxu1 }
  0xff   :  { %v964_v22 = vadd.f32 %v188_v17, %v106_v18  ;;  %v623_v17 = vld [vmem:[%s1009_s6] ss:$0 sm:$0xff] }
 0x100   :  { %v190_v19 = vpop.f32.mrf.mxu1 }
 0x101   :  { %v962_v20 = vadd.f32 %v190_v19, %v110_v16  ;;  %v240_v25 = vmul.f32 %v964_v22, %v964_v22 }
 0x102   :  { %v192_v21 = vpop.f32.mrf.mxu1 }
 0x103   :  { %272 = vadd.xlane.f32.xlu0 %v962_v20  ;;  %v275_v23 = vmul.f32 %v962_v20, %v962_v20 }
 0x104   :  { %v193_v24 = vpop.f32.mrf.mxu1 }
 0x105   :  { %276 = vadd.xlane.f32.xlu1 %v275_v23  ;;  %v620_v23 = vld [vmem:[#allocation7] ss:$0 sm:$0xff] }
 0x107   :  { %237 = vadd.xlane.f32.xlu0 %v964_v22  ;;  %v229_v39 = vpop.f32.mrf.mxu1 }
 0x108   :  { %v230_v45 = vadd.f32 %v229_v39, %v114_v44 }
 0x109   :  { %241 = vadd.xlane.f32.xlu1 %v240_v25  ;;  %v667_v40 = vpop.f32.mrf.mxu1 }
 0x10a   :  { %v556_v46 = vmul.f32 0.5, %v230_v45 }
 0x10b   :  { %v232_v41 = vpop.f32.mrf.mxu1 }
 0x10d   :  { %v668_v42 = vpop.f32.mrf.mxu1 }
 0x18c   :  { %v273_v57 = vpop.xlane.xlu0 %272 }
 0x18d   :  { %v274_v58 = vmul.f32 0.03125, %v273_v57 }
 0x18e   :  { %v277_v59 = vpop.xlane.xlu1 %276 }
 0x18f   :  { %v279_v60 = vmul.f32 %v274_v58, %v274_v58  ;;  %v278_v61 = vmul.f32 0.03125, %v277_v59  ;;  %v282_v9 = vsub.f32 %v962_v20, %v274_v58  ;;  %v621_v20 = vld [vmem:[%s1007_s4] ss:$0 sm:$0xff] }
 0x190   :  { %v238_v62 = vpop.xlane.xlu0 %237 }
 0x191   :  { %v280_v63 = vsub.f32 %v278_v61, %v279_v60  ;;  %v239_v0 = vmul.f32 0.015625, %v238_v62  ;;  %v344_v60 = vrot.slane %v307_v47, %v105_v14  ;;  %v656_v14 = vld [vmem:[%s1012_s9] ss:$0 sm:$0xff] }
 0x192   :  { %v242_v1 = vpop.xlane.xlu1 %241 }
 0x193   :  { %v281_v2 = vmax.f32 %v280_v63, 0.0  ;;  %v244_v3 = vmul.f32 %v239_v0, %v239_v0  ;;  %v243_v4 = vmul.f32 0.015625, %v242_v1  ;;  %v247_v18 = vsub.f32 %v964_v22, %v239_v0 }
 0x195   :  { %v283_v5 = vadd.f32 1e-05, %v281_v2  ;;  %v245_v6 = vsub.f32 %v243_v4, %v244_v3 }
 0x197   :  { %737 = vrsqrt.f32 %v283_v5  ;;  %v246_v7 = vmax.f32 %v245_v6, 0.0 }
 0x199   :  { %v248_v8 = vadd.f32 1e-05, %v246_v7 }
 0x19b   :  { %739 = vrsqrt.f32 %v248_v8 }
 0x1a4   :  { %v738_v10 = vpop.eup %737 }
 0x1a5   :  { %v285_v16 = vmul.f32 %v738_v10, %v282_v9 }
 0x1a7   :  { %v292_v19 = vmul.f32 %v622_v11, %v285_v16  ;;  %v657_v16 = vld [vmem:[%s1013_s10] ss:$0 sm:$0xff] }
 0x1a8   :  { %v740_v21 = vpop.eup %739 }
 0x1a9   :  { %v299_v24 = vadd.f32 %v623_v17, %v292_v19  ;;  %v250_v25 = vmul.f32 %v740_v21, %v247_v18 }
 0x1ab   :  { %v301_v26 = vmul.f32 0.70710677, %v299_v24  ;;  %v257_v27 = vmul.f32 %v620_v23, %v250_v25  ;;  %v300_v31 = vmul.f32 0.5, %v299_v24 }
 0x1ad   :  { %741 = verf.f32 %v301_v26  ;;  %v264_v28 = vadd.f32 %v621_v20, %v257_v27 }
 0x1af   :  { %v266_v29 = vmul.f32 0.70710677, %v264_v28  ;;  %v265_v35 = vmul.f32 0.5, %v264_v28 }
 0x1b1   :  { %743 = verf.f32 %v266_v29 }
 0x1b2   :  { %745 = vtanh.f32 %v556_v46 }
 0x1ba   :  { %v742_v30 = vpop.eup %741 }
 0x1bb   :  { %v303_v32 = vadd.f32 1.0, %v742_v30 }
 0x1bd   :  { %v304_v33 = vmul.f32 %v303_v32, %v300_v31 }
 0x1be   :  { %v744_v22 = vpop.eup %743 }
 0x1bf   :  { %v306_v34 = vpack.c.bf16 %v304_v33, %v304_v33  ;;  %v268_v36 = vadd.f32 1.0, %v744_v22  ;;  %v746_v55 = vpop.eup %745 }
 0x1c0   :  { %v558_v56 = vadd.f32 1.0, %v746_v55 }
 0x1c1   :  { %543 = vmatprep.mubr.bf16.mxu0 %v306_v34  ;;  %v269_v37 = vmul.f32 %v268_v36, %v265_v35 }
 0x1c2   :  { %v559_v15 = vmul.f32 0.5, %v558_v56 }
 0x1c3   :  { %v305_v38 = vpack.c.bf16 %v269_v37, %v269_v37 }
 0x1c4   :  { %v561_v59 = vmul.f32 0.3, %v559_v15 }
 0x1c5   :  { %544 = vmatmul.mubr.bf16.vlgmr.msra.gmra.mxu0 %v305_v38 }
 0x285   :  { %v545_v49 = vpop.f32.mrf.mxu0 }
 0x286   :  { %v546_v63 = vadd.f32 %v545_v49, %v344_v60 }
 0x287   :  { %v547_v50 = vpop.f32.mrf.mxu0 }
 0x288   :  { %v548_v51 = vadd.f32 %v547_v50, %v348_v48 }
 0x289   :  { %v549_v52 = vpop.f32.mrf.mxu0 }
 0x28a   :  { %v552_v53 = vmul.f32 0.5, %v548_v51 }
 0x28b   :  { %v550_v54 = vpop.f32.mrf.mxu0 }
 0x28c   :  { %747 = vtanh.f32 %v552_v53 }
 0x299   :  { %v748_v57 = vpop.eup %747 }
 0x29a   :  { %v554_v58 = vadd.f32 1.0, %v748_v57 }
 0x29c   :  { %v555_v61 = vmul.f32 0.5, %v554_v58 }
 0x29e   :  { %v560_v62 = vmul.f32 0.7, %v555_v61 }
 0x2a0   :  { %v562_v13 = vadd.f32 %v561_v59, %v560_v62 }
 0x2a2   :  { %v563_v0 = vmul.f32 %v562_v13, %v546_v63 }
 0x2a4   :  { %566 = vadd.xlane.f32.xlu0 %v563_v0  ;;  %v569_v1 = vmul.f32 %v563_v0, %v563_v0 }
 0x2a6   :  { %570 = vadd.xlane.f32.xlu1 %v569_v1 }
 0x32d   :  { %v567_v2 = vpop.xlane.xlu0 %566 }
 0x32e   :  { %v568_v3 = vmul.f32 0.015625, %v567_v2 }
 0x32f   :  { %v571_v4 = vpop.xlane.xlu1 %570 }
 0x330   :  { %v573_v5 = vmul.f32 %v568_v3, %v568_v3  ;;  %v572_v6 = vmul.f32 0.015625, %v571_v4  ;;  %v576_v10 = vsub.f32 %v563_v0, %v568_v3 }
 0x332   :  { %v574_v7 = vsub.f32 %v572_v6, %v573_v5 }
 0x334   :  { %v575_v8 = vmax.f32 %v574_v7, 0.0 }
 0x336   :  { %v577_v9 = vadd.f32 1e-05, %v575_v8 }
 0x338   :  { %749 = vrsqrt.f32 %v577_v9 }
 0x345   :  { %v750_v12 = vpop.eup %749 }
 0x346   :  { %v579_v11 = vmul.f32 %v750_v12, %v576_v10 }
 0x348   :  { %v586_v17 = vmul.f32 %v656_v14, %v579_v11 }
 0x34a   :  { %v593_v18 = vadd.f32 %v657_v16, %v586_v17 }
 0x34c   :  { %594 = vst [vmem:[#allocation10] sm:$0xff] %v593_v18 }
 0x34d   :  { %842 = shalt.err (!%p839_p10)
}
 0x34e   :  { %604 = dma.vmem_to_hbm [thread:$0]  %s602_s29, 128, %s1014_s11, [#allocation4]  }
 0x34f   :  { %857 = dma.done.wait [#allocation4], 128  }
 0x350   :  { %858 = vsyncadd [#allocation4], 4294967168 }
 0x351   :  { %608 = vsyncpa [#allocation3], 1 }
 0x352   :  { %609 = vsyncpa [#allocation6], 1 }
 0x353   :  { %610 = vsyncpa [#allocation9], 1 }
 0x354   :  { %611 = vsyncpa [#allocation4], 1 }

// kernel: tpu_custom_call.1
= control target key start
LH: loop header
LB: loop body
LE: loop exit
PB: predicated region body
PF: predicated region fallthrough
CT: control target
= control target key end

     0   :  { %16 = vsyncpa [#allocation3], 0  ;;  %s1003_s0 = inlined_call_operand.hbm [shape: f32[8,32], index: 0, kind: input, shape index: {}]   ;;  %s1004_s1 = inlined_call_operand.hbm [shape: bf16[32,384], index: 1, kind: input, shape index: {}]   ;;  %s1005_s2 = inlined_call_operand.vmem [shape: f32[1,384], index: 2, kind: input, shape index: {}]   ;;  %s1006_s3 = inlined_call_operand.hbm [shape: f32[1,128], index: 3, kind: input, shape index: {}]   ;;  %s1007_s4 = inlined_call_operand.vmem [shape: f32[1,128], index: 4, kind: input, shape index: {}]   ;;  %s1008_s5 = inlined_call_operand.vmem [shape: f32[1,128], index: 5, kind: input, shape index: {}]   ;;  %s1009_s6 = inlined_call_operand.vmem [shape: f32[1,128], index: 6, kind: input, shape index: {}]   ;;  %s1010_s7 = inlined_call_operand.hbm [shape: bf16[256,256], index: 7, kind: input, shape index: {}]   ;;  %s1011_s8 = inlined_call_operand.vmem [shape: f32[1,256], index: 8, kind: input, shape index: {}]   ;;  %s1012_s9 = inlined_call_operand.vmem [shape: f32[1,128], index: 9, kind: input, shape index: {}]   ;;  %s1013_s10 = inlined_call_operand.vmem [shape: f32[1,128], index: 10, kind: input, shape index: {}]   ;;  %s1014_s11 = inlined_call_operand.hbm [shape: f32[8,128], index: 11, kind: output, shape index: {}]  }
   0x1   :  { %17 = vsyncpa [#allocation6], 0 }
   0x2   :  { %18 = vsyncpa [#allocation9], 0 }
   0x3   :  { %19 = vsyncpa [#allocation4], 0  ;;  %s859_s17 = smov [#allocation5]  }
   0x4   :  { %s35_s18 = sshll.u32 %s859_s17, 4  ;;  %s36_s18 = int_to_ptr.vmem [resolvable:$true] %s35_s18 }
   0x5   :  { %s759_s19 = scalar_lea.vmem %s36_s18, 768  ;;  %p764_p1 = scmp.lt.s32.totalorder %s36_s18, %s36_s18 }
   0x6   :  { %p760_p0 = scmp.ne.s32.totalorder %s36_s18, %s759_s19  ;;  %p765_p2 = scmp.lt.s32.totalorder %s759_s19, %s759_s19 }
   0x8   :  { %p766_p3 = por %p765_p2, %p764_p1 }
   0xa   :  { %p767_p4 = pnand %p766_p3, %p760_p0 }
   0xc   :  { %770 = shalt.err (!%p767_p4)
}
   0xd   :  { %s860_s20 = smov 192   ;;  %s861_s21 = smov 12  }
   0xe   :  { %41 = dma.hbm_to_vmem [thread:$0]  %s1004_s1, 768, %s36_s18, [#allocation6], %s860_s20, %s860_s20, %s861_s21  }
   0xf   :  { %s862_s24 = smov [#allocation2]   ;;  %s863_s26 = smov [#allocation7]  }
  0x10   :  { %s26_s25 = sshll.u32 %s862_s24, 4  ;;  %s50_s27 = sshll.u32 %s863_s26, 4  ;;  %s27_s25 = int_to_ptr.vmem [resolvable:$true] %s26_s25  ;;  %s51_s27 = int_to_ptr.vmem [resolvable:$true] %s50_s27 }
  0x11   :  { %s779_s28 = scalar_lea.vmem %s27_s25, 128  ;;  %p784_p6 = scmp.lt.s32.totalorder %s27_s25, %s27_s25 }
  0x12   :  { %p780_p5 = scmp.ne.s32.totalorder %s27_s25, %s779_s28  ;;  %p785_p7 = scmp.lt.s32.totalorder %s779_s28, %s779_s28 }
  0x14   :  { %p786_p8 = por %p785_p7, %p784_p6 }
  0x16   :  { %p787_p9 = pnand %p786_p8, %p780_p5 }
  0x18   :  { %790 = shalt.err (!%p787_p9)
}
  0x19   :  { %29 = dma.hbm_to_vmem [thread:$0]  %s1003_s0, 128, %s27_s25, [#allocation3]  }
  0x1a   :  { %s799_s12 = scalar_lea.vmem %s51_s27, 16  ;;  %s803_s1 = scalar_lea.vmem %s51_s27, 32 }
  0x1b   :  { %p800_p10 = scmp.ne.s32.totalorder %s51_s27, %s799_s12  ;;  %p804_p11 = scmp.lt.s32.totalorder %s51_s27, %s51_s27 }
  0x1c   :  { %p805_p12 = scmp.lt.s32.totalorder %s803_s1, %s799_s12 }
  0x1e   :  { %p806_p13 = por %p805_p12, %p804_p11 }
  0x20   :  { %p807_p0 = pnand %p806_p13, %p800_p10 }
  0x22   :  { %810 = shalt.err (!%p807_p0)
}
  0x23   :  { %53 = dma.hbm_to_vmem [thread:$0]  %s1006_s3, 16, %s51_s27, [#allocation6]  }
  0x24   :  { %s864_s15 = smov [#allocation8]  }
  0x25   :  { %s65_s16 = sshll.u32 %s864_s15, 4  ;;  %s66_s16 = int_to_ptr.vmem [resolvable:$true] %s65_s16 }
  0x26   :  { %s819_s17 = scalar_lea.vmem %s66_s16, 4096  ;;  %p824_p2 = scmp.lt.s32.totalorder %s66_s16, %s66_s16 }
  0x27   :  { %p820_p1 = scmp.ne.s32.totalorder %s66_s16, %s819_s17  ;;  %p825_p3 = scmp.lt.s32.totalorder %s819_s17, %s819_s17 }
  0x29   :  { %p826_p4 = por %p825_p3, %p824_p2 }
  0x2b   :  { %p827_p5 = pnand %p826_p4, %p820_p1 }
  0x2d   :  { %830 = shalt.err (!%p827_p5)
}
  0x2e   :  { %s865_s0 = smov 128   ;;  %s866_s18 = smov 8  }
  0x2f   :  { %71 = dma.hbm_to_vmem [thread:$0]  %s1010_s7, 4096, %s66_s16, [#allocation9], %s865_s0, %s865_s0, %s866_s18  }
  0x30   :  { %851 = dma.done.wait [#allocation3], 128  }
  0x31   :  { %852 = vsyncadd [#allocation3], 4294967168 }
  0x32   :  { %853 = dma.done.wait [#allocation6], 784  }
  0x33   :  { %854 = vsyncadd [#allocation6], 4294966512 }
  0x34   :  { %855 = dma.done.wait [#allocation9], 4096  }
  0x35   :  { %856 = vsyncadd [#allocation9], 4294963200  ;;  %v867_v0 = vmov 0   ;;  %v681_v1 = vld [vmem:[#allocation5 + $0x1c] ss:$12 sps:$4 sm:$0xff]   ;;  %vm150_vm0 = vcmask 261120   ;;  %v103_v11 = vlaneseq }
  0x36   :  { %186 = vmatprep.mubr.bf16.mxu1 %v867_v0  ;;  %v683_v2 = vld [vmem:[#allocation5 + $0x18] ss:$12 sps:$4 sm:$0xff]   ;;  %166 = vmatprep.subr.bf16.mxu1 %v681_v1  ;;  %v686_v4 = vld [vmem:[#allocation5] ss:$12 sps:$4 sm:$0xff]   ;;  %v868_v39 = vmov 0.0   ;;  %vm869_vm1 = vmmov 0  }
  0x37   :  { %v684_v3 = vld [vmem:[#allocation5 + $0x4] ss:$12 sps:$4 sm:$0xff]   ;;  %167 = vmatpush1.bf16.msra.mxu1 %v683_v2  ;;  %v91_v5 = vld [vmem:[#allocation2] sm:$0xff]  ;;  %v947_v12 = vshrl.u32 %v103_v11, 7  ;;  %v728_v40 = vld [vmem:[#allocation5 + $0x20] ss:$12 sps:$4 sm:$0xff]  }
  0x38   :  { %168 = vmatprep.subr.bf16.mxu1 %v684_v3  ;;  %v943_v6 = vpack.c.bf16 %v91_v5, %v91_v5  ;;  %v687_v7 = vld [vmem:[#allocation8 + $0x74] ss:$8 sps:$4 sm:$0xff]   ;;  %v689_v8 = vld [vmem:[#allocation8 + $0x70] ss:$8 sps:$4 sm:$0xff]   ;;  %v690_v9 = vld [vmem:[#allocation8 + $0x64] ss:$8 sps:$4 sm:$0xff]  }
  0x39   :  { %511 = vmatprep.subr.bf16.mxu0 %v687_v7  ;;  %v692_v10 = vld [vmem:[#allocation8 + $0x60] ss:$8 sps:$4 sm:$0xff]   ;;  %v109_v13 = vsub.s32 1, %v947_v12  ;;  %v105_v14 = vsub.s32 0, %v947_v12  ;;  %v693_v26 = vld [vmem:[#allocation8 + $0x54] ss:$8 sps:$4 sm:$0xff]  }
  0x3a   :  { %512 = vmatpush1.bf16.msra.mxu0 %v689_v8  ;;  %v954_v15 = vld [vmem:[%s1005_s2] sm:$0x7]  ;;  %v695_v27 = vld [vmem:[#allocation8 + $0x50] ss:$8 sps:$4 sm:$0xff]   ;;  %v699_v30 = vld [vmem:[#allocation8 + $0x34] ss:$8 sps:$4 sm:$0xff]  }
  0x3b   :  { %169 = vmatpush1.bf16.msra.mxu1 %v686_v4  ;;  %513 = vmatprep.subr.bf16.mxu0 %v690_v9  ;;  %v110_v16 = vrot.slane %v954_v15, %v109_v13  ;;  %v106_v18 = vrot.slane %v954_v15, %v105_v14  ;;  %v696_v28 = vld [vmem:[#allocation8 + $0x44] ss:$8 sps:$4 sm:$0xff]   ;;  %v698_v29 = vld [vmem:[#allocation8 + $0x40] ss:$8 sps:$4 sm:$0xff]   ;;  %v701_v31 = vld [vmem:[#allocation8 + $0x30] ss:$8 sps:$4 sm:$0xff]  }
  0x3c   :  { %v702_v32 = vld [vmem:[#allocation8 + $0x24] ss:$8 sps:$4 sm:$0xff]   ;;  %v704_v33 = vld [vmem:[#allocation8 + $0x20] ss:$8 sps:$4 sm:$0xff]   ;;  %v705_v34 = vld [vmem:[#allocation8 + $0x14] ss:$8 sps:$4 sm:$0xff]   ;;  %661 = vmatprep.subr.bf16.mxu1 %v868_v39 }
  0x3d   :  { %v707_v35 = vld [vmem:[#allocation8 + $0x10] ss:$8 sps:$4 sm:$0xff]   ;;  %v708_v36 = vld [vmem:[#allocation8 + $0x4] ss:$8 sps:$4 sm:$0xff]   ;;  %v710_v37 = vld [vmem:[#allocation8] ss:$8 sps:$4 sm:$0xff]  }
  0x3e   :  { %618 = vmatmul.mubr.msk.bf16.vlgmr.msra.gmra.mxu1 %vm150_vm0, %v943_v6  ;;  %514 = vmatpush1.bf16.msra.mxu0 %v692_v10  ;;  %v711_v38 = vld [vmem:[#allocation8 + $0xf4] ss:$8 sps:$4 sm:$0xff]   ;;  %v713_v41 = vld [vmem:[#allocation8 + $0xf0] ss:$8 sps:$4 sm:$0xff]   ;;  %v714_v43 = vld [vmem:[#allocation8 + $0xe4] ss:$8 sps:$4 sm:$0xff]  }
  0x3f   :  { %515 = vmatprep.subr.bf16.mxu0 %v693_v26  ;;  %665 = vmatprep.mubr.msk.bf16.mxu1 %vm869_vm1, %v868_v39  ;;  %v732_v42 = vld [vmem:[#allocation5 + $0x8] ss:$12 sps:$4 sm:$0xff]   ;;  %v622_v11 = vld [vmem:[%s1008_s5] ss:$0 sm:$0xff]  ;;  %s870_s28 = smov [#allocation10]  }
  0x40   :  { %662 = vmatpush3.bf16.msra.mxu1 %v728_v40  ;;  %v716_v44 = vld [vmem:[#allocation8 + $0xe0] ss:$8 sps:$4 sm:$0xff]   ;;  %v717_v45 = vld [vmem:[#allocation8 + $0xd4] ss:$8 sps:$4 sm:$0xff]   ;;  %v719_v46 = vld [vmem:[#allocation8 + $0xd0] ss:$8 sps:$4 sm:$0xff]  }
  0x41   :  { %663 = vmatprep.subr.bf16.mxu1 %v868_v39  ;;  %v720_v47 = vld [vmem:[#allocation8 + $0xc4] ss:$8 sps:$4 sm:$0xff]   ;;  %v722_v48 = vld [vmem:[#allocation8 + $0xc0] ss:$8 sps:$4 sm:$0xff]   ;;  %v723_v49 = vld [vmem:[#allocation8 + $0xb4] ss:$8 sps:$4 sm:$0xff]  }
  0x42   :  { %516 = vmatpush1.bf16.msra.mxu0 %v695_v27  ;;  %v725_v50 = vld [vmem:[#allocation8 + $0xb0] ss:$8 sps:$4 sm:$0xff]   ;;  %v726_v51 = vld [vmem:[#allocation8 + $0xa4] ss:$8 sps:$4 sm:$0xff]   ;;  %v729_v52 = vld [vmem:[#allocation8 + $0xa0] ss:$8 sps:$4 sm:$0xff]  }
  0x43   :  { %517 = vmatprep.subr.bf16.mxu0 %v696_v28  ;;  %v730_v53 = vld [vmem:[#allocation8 + $0x94] ss:$8 sps:$4 sm:$0xff]   ;;  %v733_v54 = vld [vmem:[#allocation8 + $0x90] ss:$8 sps:$4 sm:$0xff]   ;;  %v734_v55 = vld [vmem:[#allocation8 + $0x84] ss:$8 sps:$4 sm:$0xff]  }
  0x44   :  { %664 = vmatpush3.bf16.msra.mxu1 %v732_v42  ;;  %v736_v56 = vld [vmem:[#allocation8 + $0x80] ss:$8 sps:$4 sm:$0xff]   ;;  %s601_s29 = sshll.u32 %s870_s28, 4  ;;  %s602_s29 = int_to_ptr.vmem [resolvable:$true] %s601_s29 }
  0x45   :  { %s831_s30 = scalar_lea.vmem %s602_s29, 128  ;;  %p836_p7 = scmp.lt.s32.totalorder %s602_s29, %s602_s29 }
  0x46   :  { %518 = vmatpush1.bf16.msra.mxu0 %v698_v29  ;;  %p832_p6 = scmp.ne.s32.totalorder %s602_s29, %s831_s30  ;;  %p837_p8 = scmp.lt.s32.totalorder %s831_s30, %s831_s30 }
  0x47   :  { %519 = vmatprep.subr.bf16.mxu0 %v699_v30  ;;  %666 = vmatmul.mubr.msk.bf16.vlgmr.msra.gmra.mxu1 %vm150_vm0, %v943_v6 }
  0x48   :  { %p838_p9 = por %p837_p8, %p836_p7 }
  0x4a   :  { %520 = vmatpush1.bf16.msra.mxu0 %v701_v31  ;;  %p839_p10 = pnand %p838_p9, %p832_p6 }
  0x4b   :  { %521 = vmatprep.subr.bf16.mxu0 %v702_v32 }
  0x4e   :  { %522 = vmatpush1.bf16.msra.mxu0 %v704_v33 }
  0x4f   :  { %523 = vmatprep.subr.bf16.mxu0 %v705_v34 }
  0x52   :  { %524 = vmatpush1.bf16.msra.mxu0 %v707_v35 }
  0x53   :  { %525 = vmatprep.subr.bf16.mxu0 %v708_v36 }
  0x56   :  { %526 = vmatpush1.bf16.msra.mxu0 %v710_v37 }
  0x57   :  { %527 = vmatprep.subr.bf16.mxu0 %v711_v38 }
  0x5a   :  { %528 = vmatpush2.bf16.msra.mxu0 %v713_v41 }
  0x5b   :  { %529 = vmatprep.subr.bf16.mxu0 %v714_v43  ;;  %v113_v43 = vsub.s32 2, %v947_v12 }
  0x5e   :  { %530 = vmatpush2.bf16.msra.mxu0 %v716_v44  ;;  %v114_v44 = vrot.slane %v954_v15, %v113_v43 }
  0x5f   :  { %531 = vmatprep.subr.bf16.mxu0 %v717_v45 }
  0x62   :  { %532 = vmatpush2.bf16.msra.mxu0 %v719_v46 }
  0x63   :  { %533 = vmatprep.subr.bf16.mxu0 %v720_v47  ;;  %v307_v47 = vld [vmem:[%s1011_s8] sm:$0x3] }
  0x66   :  { %534 = vmatpush2.bf16.msra.mxu0 %v722_v48  ;;  %v348_v48 = vrot.slane %v307_v47, %v109_v13 }
  0x67   :  { %535 = vmatprep.subr.bf16.mxu0 %v723_v49 }
  0x6a   :  { %536 = vmatpush2.bf16.msra.mxu0 %v725_v50 }
  0x6b   :  { %537 = vmatprep.subr.bf16.mxu0 %v726_v51 }
  0x6e   :  { %538 = vmatpush2.bf16.msra.mxu0 %v729_v52 }
  0x6f   :  { %539 = vmatprep.subr.bf16.mxu0 %v730_v53 }
  0x72   :  { %540 = vmatpush2.bf16.msra.mxu0 %v733_v54 }
  0x73   :  { %541 = vmatprep.subr.bf16.mxu0 %v734_v55 }
  0x76   :  { %542 = vmatpush2.bf16.msra.mxu0 %v736_v56 }
  0xfe   :  { %v188_v17 = vpop.f32.mrf.mxu1 }
  0xff   :  { %v964_v22 = vadd.f32 %v188_v17, %v106_v18  ;;  %v623_v17 = vld [vmem:[%s1009_s6] ss:$0 sm:$0xff] }
 0x100   :  { %v190_v19 = vpop.f32.mrf.mxu1 }
 0x101   :  { %v962_v20 = vadd.f32 %v190_v19, %v110_v16  ;;  %v240_v25 = vmul.f32 %v964_v22, %v964_v22 }
 0x102   :  { %v192_v21 = vpop.f32.mrf.mxu1 }
 0x103   :  { %272 = vadd.xlane.f32.xlu0 %v962_v20  ;;  %v275_v23 = vmul.f32 %v962_v20, %v962_v20 }
 0x104   :  { %v193_v24 = vpop.f32.mrf.mxu1 }
 0x105   :  { %276 = vadd.xlane.f32.xlu1 %v275_v23  ;;  %v620_v23 = vld [vmem:[#allocation7] ss:$0 sm:$0xff] }
 0x107   :  { %237 = vadd.xlane.f32.xlu0 %v964_v22  ;;  %v229_v39 = vpop.f32.mrf.mxu1 }
 0x108   :  { %v230_v45 = vadd.f32 %v229_v39, %v114_v44 }
 0x109   :  { %241 = vadd.xlane.f32.xlu1 %v240_v25  ;;  %v667_v40 = vpop.f32.mrf.mxu1 }
 0x10a   :  { %v556_v46 = vmul.f32 0.5, %v230_v45 }
 0x10b   :  { %v232_v41 = vpop.f32.mrf.mxu1 }
 0x10d   :  { %v668_v42 = vpop.f32.mrf.mxu1 }
 0x18c   :  { %v273_v57 = vpop.xlane.xlu0 %272 }
 0x18d   :  { %v274_v58 = vmul.f32 0.03125, %v273_v57 }
 0x18e   :  { %v277_v59 = vpop.xlane.xlu1 %276 }
 0x18f   :  { %v279_v60 = vmul.f32 %v274_v58, %v274_v58  ;;  %v278_v61 = vmul.f32 0.03125, %v277_v59  ;;  %v282_v9 = vsub.f32 %v962_v20, %v274_v58  ;;  %v621_v20 = vld [vmem:[%s1007_s4] ss:$0 sm:$0xff] }
 0x190   :  { %v238_v62 = vpop.xlane.xlu0 %237 }
 0x191   :  { %v280_v63 = vsub.f32 %v278_v61, %v279_v60  ;;  %v239_v0 = vmul.f32 0.015625, %v238_v62  ;;  %v344_v60 = vrot.slane %v307_v47, %v105_v14  ;;  %v656_v14 = vld [vmem:[%s1012_s9] ss:$0 sm:$0xff] }
 0x192   :  { %v242_v1 = vpop.xlane.xlu1 %241 }
 0x193   :  { %v281_v2 = vmax.f32 %v280_v63, 0.0  ;;  %v244_v3 = vmul.f32 %v239_v0, %v239_v0  ;;  %v243_v4 = vmul.f32 0.015625, %v242_v1  ;;  %v247_v18 = vsub.f32 %v964_v22, %v239_v0 }
 0x195   :  { %v283_v5 = vadd.f32 1e-05, %v281_v2  ;;  %v245_v6 = vsub.f32 %v243_v4, %v244_v3 }
 0x197   :  { %737 = vrsqrt.f32 %v283_v5  ;;  %v246_v7 = vmax.f32 %v245_v6, 0.0 }
 0x199   :  { %v248_v8 = vadd.f32 1e-05, %v246_v7 }
 0x19b   :  { %739 = vrsqrt.f32 %v248_v8 }
 0x1a4   :  { %v738_v10 = vpop.eup %737 }
 0x1a5   :  { %v285_v16 = vmul.f32 %v738_v10, %v282_v9 }
 0x1a7   :  { %v292_v19 = vmul.f32 %v622_v11, %v285_v16  ;;  %v657_v16 = vld [vmem:[%s1013_s10] ss:$0 sm:$0xff] }
 0x1a8   :  { %v740_v21 = vpop.eup %739 }
 0x1a9   :  { %v299_v24 = vadd.f32 %v623_v17, %v292_v19  ;;  %v250_v25 = vmul.f32 %v740_v21, %v247_v18 }
 0x1ab   :  { %v301_v26 = vmul.f32 0.70710677, %v299_v24  ;;  %v257_v27 = vmul.f32 %v620_v23, %v250_v25  ;;  %v300_v31 = vmul.f32 0.5, %v299_v24 }
 0x1ad   :  { %741 = verf.f32 %v301_v26  ;;  %v264_v28 = vadd.f32 %v621_v20, %v257_v27 }
 0x1af   :  { %v266_v29 = vmul.f32 0.70710677, %v264_v28  ;;  %v265_v35 = vmul.f32 0.5, %v264_v28 }
 0x1b1   :  { %743 = verf.f32 %v266_v29 }
 0x1b2   :  { %745 = vtanh.f32 %v556_v46 }
 0x1ba   :  { %v742_v30 = vpop.eup %741 }
 0x1bb   :  { %v303_v32 = vadd.f32 1.0, %v742_v30 }
 0x1bd   :  { %v304_v33 = vmul.f32 %v303_v32, %v300_v31 }
 0x1be   :  { %v744_v22 = vpop.eup %743 }
 0x1bf   :  { %v306_v34 = vpack.c.bf16 %v304_v33, %v304_v33  ;;  %v268_v36 = vadd.f32 1.0, %v744_v22  ;;  %v746_v55 = vpop.eup %745 }
 0x1c0   :  { %v558_v56 = vadd.f32 1.0, %v746_v55 }
 0x1c1   :  { %543 = vmatprep.mubr.bf16.mxu0 %v306_v34  ;;  %v269_v37 = vmul.f32 %v268_v36, %v265_v35 }
 0x1c2   :  { %v559_v15 = vmul.f32 0.5, %v558_v56 }
 0x1c3   :  { %v305_v38 = vpack.c.bf16 %v269_v37, %v269_v37 }
 0x1c4   :  { %v561_v59 = vmul.f32 0.3, %v559_v15 }
 0x1c5   :  { %544 = vmatmul.mubr.bf16.vlgmr.msra.gmra.mxu0 %v305_v38 }
 0x285   :  { %v545_v49 = vpop.f32.mrf.mxu0 }
 0x286   :  { %v546_v63 = vadd.f32 %v545_v49, %v344_v60 }
 0x287   :  { %v547_v50 = vpop.f32.mrf.mxu0 }
 0x288   :  { %v548_v51 = vadd.f32 %v547_v50, %v348_v48 }
 0x289   :  { %v549_v52 = vpop.f32.mrf.mxu0 }
 0x28a   :  { %v552_v53 = vmul.f32 0.5, %v548_v51 }
 0x28b   :  { %v550_v54 = vpop.f32.mrf.mxu0 }
 0x28c   :  { %747 = vtanh.f32 %v552_v53 }
 0x299   :  { %v748_v57 = vpop.eup %747 }
 0x29a   :  { %v554_v58 = vadd.f32 1.0, %v748_v57 }
 0x29c   :  { %v555_v61 = vmul.f32 0.5, %v554_v58 }
 0x29e   :  { %v560_v62 = vmul.f32 0.7, %v555_v61 }
 0x2a0   :  { %v562_v13 = vadd.f32 %v561_v59, %v560_v62 }
 0x2a2   :  { %v563_v0 = vmul.f32 %v562_v13, %v546_v63 }
 0x2a4   :  { %566 = vadd.xlane.f32.xlu0 %v563_v0  ;;  %v569_v1 = vmul.f32 %v563_v0, %v563_v0 }
 0x2a6   :  { %570 = vadd.xlane.f32.xlu1 %v569_v1 }
 0x32d   :  { %v567_v2 = vpop.xlane.xlu0 %566 }
 0x32e   :  { %v568_v3 = vmul.f32 0.015625, %v567_v2 }
 0x32f   :  { %v571_v4 = vpop.xlane.xlu1 %570 }
 0x330   :  { %v573_v5 = vmul.f32 %v568_v3, %v568_v3  ;;  %v572_v6 = vmul.f32 0.015625, %v571_v4  ;;  %v576_v10 = vsub.f32 %v563_v0, %v568_v3 }
 0x332   :  { %v574_v7 = vsub.f32 %v572_v6, %v573_v5 }
 0x334   :  { %v575_v8 = vmax.f32 %v574_v7, 0.0 }
 0x336   :  { %v577_v9 = vadd.f32 1e-05, %v575_v8 }
 0x338   :  { %749 = vrsqrt.f32 %v577_v9 }
 0x345   :  { %v750_v12 = vpop.eup %749 }
 0x346   :  { %v579_v11 = vmul.f32 %v750_v12, %v576_v10 }
 0x348   :  { %v586_v17 = vmul.f32 %v656_v14, %v579_v11 }
 0x34a   :  { %v593_v18 = vadd.f32 %v657_v16, %v586_v17 }
 0x34c   :  { %594 = vst [vmem:[#allocation10] sm:$0xff] %v593_v18 }
 0x34d   :  { %842 = shalt.err (!%p839_p10)
}
 0x34e   :  { %604 = dma.vmem_to_hbm [thread:$0]  %s602_s29, 128, %s1014_s11, [#allocation4]  }
 0x34f   :  { %857 = dma.done.wait [#allocation4], 128  }
 0x350   :  { %858 = vsyncadd [#allocation4], 4294967168 }
 0x351   :  { %608 = vsyncpa [#allocation3], 1 }
 0x352   :  { %609 = vsyncpa [#allocation6], 1 }
 0x353   :  { %610 = vsyncpa [#allocation9], 1 }
 0x354   :  { %611 = vsyncpa [#allocation4], 1 }

</bundles_post_ra>
